<compile_context>
chip_gen: v6e
topology: v6e:2x2x1
jax: 0.10.0
libtpu: 0.0.40
codegen_flags: <defaults>
</compile_context>

<pallas_src>
import functools
import math

import jax
import jax.numpy as jnp
import numpy as np
from jax.experimental import pallas as pl
from jax.experimental.pallas import tpu as pltpu


# ---------------------------------------------------------------------------
# In-kernel helpers (traced inside the Pallas kernel body)
# ---------------------------------------------------------------------------
def _layernorm(x, alpha, bias, eps=1e-6):
    # Matches the PyTorch module exactly: unbiased std (ddof=1), divide by (std+eps).
    mean = jnp.mean(x, axis=-1, keepdims=True)
    d = x - mean
    var = jnp.sum(d * d, axis=-1, keepdims=True) * (1.0 / (x.shape[-1] - 1))
    return alpha * (d / (jnp.sqrt(var) + eps)) + bias


# ---------------------------------------------------------------------------
# Pallas kernel: one full decoder block per batch block
# ---------------------------------------------------------------------------
def _decoder_kernel(enc_ref, x_ref, srs_ref, targ_ref,
                    sa_wqkv, sa_wo, ca_wq, ca_wkv, ca_wo,
                    ff_w1, ff_b1, ff_w2, ff_b2,
                    ln0_a, ln0_b, ln1_a, ln1_b, ln2_a, ln2_b,
                    o_ref, ctx_buf, *, H, mm_dtype):
    Bb, St, D = x_ref.shape
    Ss = enc_ref.shape[1]
    dh = D // H

    def mm(a, w):
        # MXU matmul: inputs cast to the (possibly bf16) weight dtype, f32 accumulate.
        return jnp.dot(a.astype(w.dtype), w, preferred_element_type=jnp.float32)

    x = x_ref[...].reshape(Bb * St, D).astype(jnp.float32)
    enc = enc_ref[...].reshape(Bb * Ss, D).astype(jnp.float32)

    # Masks -> additive biases, computed once (hoisted out of the head loops).
    tbias = jnp.where(targ_ref[...].reshape(Bb, St, St) == 0,
                      jnp.float32(-1e9), jnp.float32(0.0))       # (Bb, St, St)
    sbias = jnp.where(srs_ref[...].reshape(Bb, 1, Ss) == 0,
                      jnp.float32(-1e9), jnp.float32(0.0))       # (Bb, 1, Ss)

    def attention(q, k, v, bias, wo, Sk):
        # q: (Bb*St, D) with the 1/sqrt(dh) scale already folded into the weights;
        # k, v: (Bb*Sk, D); bias broadcastable to (Bb, St, Sk).
        q3 = q.reshape(Bb, St, D)
        k3 = k.reshape(Bb, Sk, D)
        v3 = v.reshape(Bb, Sk, D)
        for h in range(H):
            sl = slice(h * dh, (h + 1) * dh)
            s = jnp.einsum('bqd,bkd->bqk',
                           q3[:, :, sl].astype(mm_dtype),
                           k3[:, :, sl].astype(mm_dtype),
                           preferred_element_type=jnp.float32)    # (Bb, St, Sk)
            s = s + bias
            s = s - jnp.max(s, axis=-1, keepdims=True)
            p = jnp.exp(s)
            p = p * pl.reciprocal(jnp.sum(p, axis=-1, keepdims=True), approx=True)
            ctx = jnp.einsum('bqk,bkd->bqd',
                             p.astype(mm_dtype),
                             v3[:, :, sl].astype(mm_dtype),
                             preferred_element_type=jnp.float32)  # (Bb, St, dh)
            ctx_buf[:, sl] = ctx.reshape(Bb * St, dh)
        # Single full-width output projection (one K=D pass instead of H K=dh passes).
        return mm(ctx_buf[...], wo)

    # --- residual 0: self-attention (pre-norm), fused QKV projection ---
    xn = _layernorm(x, ln0_a[...], ln0_b[...])
    qkv = mm(xn, sa_wqkv[...])                                    # (Bb*St, 3D)
    x = x + attention(qkv[:, 0:D], qkv[:, D:2 * D], qkv[:, 2 * D:3 * D],
                      tbias, sa_wo[...], St)

    # --- residual 1: cross-attention, fused KV projection of encoder output ---
    xn = _layernorm(x, ln1_a[...], ln1_b[...])
    q = mm(xn, ca_wq[...])
    kv = mm(enc, ca_wkv[...])                                     # (Bb*Ss, 2D)
    x = x + attention(q, kv[:, 0:D], kv[:, D:2 * D], sbias, ca_wo[...], Ss)

    # --- residual 2: feed-forward ---
    xn = _layernorm(x, ln2_a[...], ln2_b[...])
    hdn = jnp.maximum(mm(xn, ff_w1[...]) + ff_b1[...], 0.0)
    x = x + mm(hdn, ff_w2[...]) + ff_b2[...]

    o_ref[...] = x.reshape(Bb, St, D).astype(o_ref.dtype)


# ---------------------------------------------------------------------------
# One-time parameter preparation (fusion + scale folding), NOT per forward call
# ---------------------------------------------------------------------------
def prepare_decoder_params(params, H, matmul_dtype=jnp.float32):
    """Fuse QKV / KV projections, fold 1/sqrt(d_head) into the query weights,
    reshape vectors to 2-D, and optionally store matmul weights in bf16.
    Biases and LayerNorm parameters stay f32 (VPU/EUP math stays f32)."""
    D = params['sa_wq'].shape[0]
    scale = jnp.float32(1.0 / math.sqrt(D // H))

    def wcast(w):
        return w.astype(matmul_dtype)

    return [
        wcast(jnp.concatenate([params['sa_wq'] * scale, params['sa_wk'],
                               params['sa_wv']], axis=1)),        # (D, 3D)
        wcast(params['sa_wo']),
        wcast(params['ca_wq'] * scale),
        wcast(jnp.concatenate([params['ca_wk'], params['ca_wv']], axis=1)),  # (D, 2D)
        wcast(params['ca_wo']),
        wcast(params['ff_w1']), params['ff_b1'].reshape(1, -1).astype(jnp.float32),
        wcast(params['ff_w2']), params['ff_b2'].reshape(1, -1).astype(jnp.float32),
        params['ln0_a'].reshape(1, -1).astype(jnp.float32),
        params['ln0_b'].reshape(1, -1).astype(jnp.float32),
        params['ln1_a'].reshape(1, -1).astype(jnp.float32),
        params['ln1_b'].reshape(1, -1).astype(jnp.float32),
        params['ln2_a'].reshape(1, -1).astype(jnp.float32),
        params['ln2_b'].reshape(1, -1).astype(jnp.float32),
    ]


def decoder_block(encoder_output, x, srs_mask, targ_mask, fused_params, H,
                  matmul_dtype=jnp.float32, b_blk=None):
    B, S_t, D = x.shape
    S_s = encoder_output.shape[1]
    if b_blk is None:
        b_blk = B                       # fold the whole batch into one grid step
    assert B % b_blk == 0
    n_blk = B // b_blk

    # Weights / LN params: whole array resident in VMEM, single copy (no per-step
    # double buffering since they never change across the grid).
    vmem_spec = pl.BlockSpec(memory_space=pltpu.MemorySpace.VMEM)

    in_specs = [
        pl.BlockSpec((b_blk, S_s, D), lambda b: (b, 0, 0)),          # encoder_output
        pl.BlockSpec((b_blk, S_t, D), lambda b: (b, 0, 0)),          # X
        pl.BlockSpec((b_blk, 1, 1, S_s), lambda b: (b, 0, 0, 0)),    # srs_mask
        pl.BlockSpec((b_blk, 1, S_t, S_t), lambda b: (b, 0, 0, 0)),  # targ_mask
    ] + [vmem_spec] * len(fused_params)

    out_spec = pl.BlockSpec((b_blk, S_t, D), lambda b: (b, 0, 0))

    return pl.pallas_call(
        functools.partial(_decoder_kernel, H=H, mm_dtype=matmul_dtype),
        out_shape=jax.ShapeDtypeStruct((B, S_t, D), x.dtype),
        grid=(n_blk,),
        in_specs=in_specs,
        out_specs=out_spec,
        scratch_shapes=[pltpu.VMEM((b_blk * S_t, D), jnp.float32)],   # head-context slab
        compiler_params=pltpu.CompilerParams(
            dimension_semantics=("arbitrary",),
            vmem_limit_bytes=32 * 1024 * 1024),
    )(encoder_output, x, srs_mask, targ_mask, *fused_params)


# ---------------------------------------------------------------------------
# Pure-JAX reference (mirrors the PyTorch forward, dropout = identity)
# ---------------------------------------------------------------------------
def decoder_block_ref(encoder_output, x, srs_mask, targ_mask, params, H):
    def ln(x, a, b, eps=1e-6):
        mean = x.mean(-1, keepdims=True)
        d = x - mean
        std = jnp.sqrt((d * d).sum(-1, keepdims=True) / (x.shape[-1] - 1))
        return a * d / (std + eps) + b

    def mha(xq, xk, xv, mask, wq, wk, wv, wo):
        B, Sq, D = xq.shape
        Sk = xk.shape[1]
        dh = D // H
        q = (xq @ wq).reshape(B, Sq, H, dh).transpose(0, 2, 1, 3)
        k = (xk @ wk).reshape(B, Sk, H, dh).transpose(0, 2, 1, 3)
        v = (xv @ wv).reshape(B, Sk, H, dh).transpose(0, 2, 1, 3)
        s = (q @ k.transpose(0, 1, 3, 2)) / math.sqrt(dh)
        s = jnp.where(mask == 0, -1e9, s)
        a = jax.nn.softmax(s, axis=-1)
        o = (a @ v).transpose(0, 2, 1, 3).reshape(B, Sq, D)
        return o @ wo

    p = params
    xn = ln(x, p['ln0_a'], p['ln0_b'])
    x = x + mha(xn, xn, xn, targ_mask, p['sa_wq'], p['sa_wk'], p['sa_wv'], p['sa_wo'])
    xn = ln(x, p['ln1_a'], p['ln1_b'])
    x = x + mha(xn, encoder_output, encoder_output, srs_mask,
                p['ca_wq'], p['ca_wk'], p['ca_wv'], p['ca_wo'])
    xn = ln(x, p['ln2_a'], p['ln2_b'])
    h = jax.nn.relu(xn @ p['ff_w1'] + p['ff_b1'])
    x = x + (h @ p['ff_w2'] + p['ff_b2'])
    return x


# ---------------------------------------------------------------------------
if __name__ == "__main__":
    B, S_t, S_s, D, D_FF, H = 2, 8, 8, 32, 64, 4

    key = jax.random.PRNGKey(0)
    ks = jax.random.split(key, 16)

    def w(k, shape, scale=0.1):
        return (scale * jax.random.normal(k, shape)).astype(jnp.float32)

    params = {
        'sa_wq': w(ks[0], (D, D)), 'sa_wk': w(ks[1], (D, D)),
        'sa_wv': w(ks[2], (D, D)), 'sa_wo': w(ks[3], (D, D)),
        'ca_wq': w(ks[4], (D, D)), 'ca_wk': w(ks[5], (D, D)),
        'ca_wv': w(ks[6], (D, D)), 'ca_wo': w(ks[7], (D, D)),
        'ff_w1': w(ks[8], (D, D_FF)), 'ff_b1': w(ks[9], (D_FF,)),
        'ff_w2': w(ks[10], (D_FF, D)), 'ff_b2': w(ks[11], (D,)),
        'ln0_a': jnp.ones((D,), jnp.float32), 'ln0_b': jnp.zeros((D,), jnp.float32),
        'ln1_a': jnp.ones((D,), jnp.float32), 'ln1_b': jnp.zeros((D,), jnp.float32),
        'ln2_a': jnp.ones((D,), jnp.float32), 'ln2_b': jnp.zeros((D,), jnp.float32),
    }

    encoder_output = w(ks[12], (B, S_s, D), scale=1.0)
    X = w(ks[13], (B, S_t, D), scale=1.0)

    # Causal target mask (B, 1, S_t, S_t); source mask (B, 1, 1, S_s) with the
    # last two source positions of batch element 1 masked out.
    targ_mask = jnp.asarray(jnp.broadcast_to(
        jnp.tril(jnp.ones((S_t, S_t), jnp.int32)), (B, 1, S_t, S_t)))
    srs_mask = jnp.ones((B, 1, 1, S_s), jnp.int32)
    srs_mask = srs_mask.at[1, :, :, S_s - 2:].set(0)

    ref = decoder_block_ref(encoder_output, X, srs_mask, targ_mask, params, H)

    # f32 MXU path: exact LayerNorm divide; the only intentional deviation is the
    # approximate EUP reciprocal in the softmax denominator (~1e-3 rel error).
    fused_f32 = prepare_decoder_params(params, H, jnp.float32)
    out = decoder_block(encoder_output, X, srs_mask, targ_mask, fused_f32, H,
                        matmul_dtype=jnp.float32)
    out = jax.block_until_ready(out)
    np.testing.assert_allclose(np.asarray(out), np.asarray(ref),
                               rtol=3e-3, atol=3e-3)

    # bf16 MXU-input path (weights stored bf16, f32 accumulation, f32 softmax/LN):
    # halves resident weight VMEM and feeds the bf16 MXU on v5e/v6e/v7x.
    fused_bf16 = prepare_decoder_params(params, H, jnp.bfloat16)
    out_bf16 = decoder_block(encoder_output, X, srs_mask, targ_mask, fused_bf16, H,
                             matmul_dtype=jnp.bfloat16)
    out_bf16 = jax.block_until_ready(out_bf16)
    np.testing.assert_allclose(np.asarray(out_bf16), np.asarray(ref),
                               rtol=5e-2, atol=5e-2)

    print("KERNEL_OK")
</pallas_src>

<mosaic_0001>
module attributes {stable_mosaic.version = 11 : i64} {
  func.func @_decoder_kernel(%arg0: i32, %arg1: memref<2x8x32xf32, #tpu.memory_space<vmem>>, %arg2: memref<2x8x32xf32, #tpu.memory_space<vmem>>, %arg3: memref<2x1x1x8xi32, #tpu.memory_space<vmem>>, %arg4: memref<2x1x8x8xi32, #tpu.memory_space<vmem>>, %arg5: memref<32x96xf32, #tpu.memory_space<vmem>>, %arg6: memref<32x32xf32, #tpu.memory_space<vmem>>, %arg7: memref<32x32xf32, #tpu.memory_space<vmem>>, %arg8: memref<32x64xf32, #tpu.memory_space<vmem>>, %arg9: memref<32x32xf32, #tpu.memory_space<vmem>>, %arg10: memref<32x64xf32, #tpu.memory_space<vmem>>, %arg11: memref<1x64xf32, #tpu.memory_space<vmem>>, %arg12: memref<64x32xf32, #tpu.memory_space<vmem>>, %arg13: memref<1x32xf32, #tpu.memory_space<vmem>>, %arg14: memref<1x32xf32, #tpu.memory_space<vmem>>, %arg15: memref<1x32xf32, #tpu.memory_space<vmem>>, %arg16: memref<1x32xf32, #tpu.memory_space<vmem>>, %arg17: memref<1x32xf32, #tpu.memory_space<vmem>>, %arg18: memref<1x32xf32, #tpu.memory_space<vmem>>, %arg19: memref<1x32xf32, #tpu.memory_space<vmem>>, %arg20: memref<2x8x32xf32, #tpu.memory_space<vmem>>, %arg21: memref<16x32xf32, #tpu.memory_space<vmem>>) attributes {dimension_semantics = [#tpu.dimension_semantics<arbitrary>], iteration_bounds = array<i64: 1>, scalar_prefetch = 0 : i64, scratch_operands = 1 : i64, tpu.core_type = #tpu.core_type<tc>, window_params = [{transform_indices = @transform_0, window_bounds = array<i64: 2, 8, 32>}, {transform_indices = @transform_1, window_bounds = array<i64: 2, 8, 32>}, {transform_indices = @transform_2, window_bounds = array<i64: 2, 1, 1, 8>}, {transform_indices = @transform_3, window_bounds = array<i64: 2, 1, 8, 8>}, {pipeline_mode = #tpu.pipeline_mode<synchronous>, transform_indices = @transform_4, window_bounds = array<i64: 32, 96>}, {pipeline_mode = #tpu.pipeline_mode<synchronous>, transform_indices = @transform_5, window_bounds = array<i64: 32, 32>}, {pipeline_mode = #tpu.pipeline_mode<synchronous>, transform_indices = @transform_6, window_bounds = array<i64: 32, 32>}, {pipeline_mode = #tpu.pipeline_mode<synchronous>, transform_indices = @transform_7, window_bounds = array<i64: 32, 64>}, {pipeline_mode = #tpu.pipeline_mode<synchronous>, transform_indices = @transform_8, window_bounds = array<i64: 32, 32>}, {pipeline_mode = #tpu.pipeline_mode<synchronous>, transform_indices = @transform_9, window_bounds = array<i64: 32, 64>}, {pipeline_mode = #tpu.pipeline_mode<synchronous>, transform_indices = @transform_10, window_bounds = array<i64: 1, 64>}, {pipeline_mode = #tpu.pipeline_mode<synchronous>, transform_indices = @transform_11, window_bounds = array<i64: 64, 32>}, {pipeline_mode = #tpu.pipeline_mode<synchronous>, transform_indices = @transform_12, window_bounds = array<i64: 1, 32>}, {pipeline_mode = #tpu.pipeline_mode<synchronous>, transform_indices = @transform_13, window_bounds = array<i64: 1, 32>}, {pipeline_mode = #tpu.pipeline_mode<synchronous>, transform_indices = @transform_14, window_bounds = array<i64: 1, 32>}, {pipeline_mode = #tpu.pipeline_mode<synchronous>, transform_indices = @transform_15, window_bounds = array<i64: 1, 32>}, {pipeline_mode = #tpu.pipeline_mode<synchronous>, transform_indices = @transform_16, window_bounds = array<i64: 1, 32>}, {pipeline_mode = #tpu.pipeline_mode<synchronous>, transform_indices = @transform_17, window_bounds = array<i64: 1, 32>}, {pipeline_mode = #tpu.pipeline_mode<synchronous>, transform_indices = @transform_18, window_bounds = array<i64: 1, 32>}, {transform_indices = @transform_19, window_bounds = array<i64: 2, 8, 32>}]} {
    %c0 = arith.constant 0 : index
    %c0_0 = arith.constant 0 : index
    %c0_1 = arith.constant 0 : index
    %0 = vector.load %arg2[%c0, %c0_0, %c0_1] : memref<2x8x32xf32, #tpu.memory_space<vmem>>, vector<2x8x32xf32>
    %1 = vector.shape_cast %0 : vector<2x8x32xf32> to vector<16x32xf32>
    %c0_2 = arith.constant 0 : index
    %c0_3 = arith.constant 0 : index
    %c0_4 = arith.constant 0 : index
    %2 = vector.load %arg1[%c0_2, %c0_3, %c0_4] : memref<2x8x32xf32, #tpu.memory_space<vmem>>, vector<2x8x32xf32>
    %3 = vector.shape_cast %2 : vector<2x8x32xf32> to vector<16x32xf32>
    %c0_5 = arith.constant 0 : index
    %c0_6 = arith.constant 0 : index
    %c0_7 = arith.constant 0 : index
    %c0_8 = arith.constant 0 : index
    %4 = vector.load %arg4[%c0_5, %c0_6, %c0_7, %c0_8] : memref<2x1x8x8xi32, #tpu.memory_space<vmem>>, vector<2x1x8x8xi32>
    %5 = vector.shape_cast %4 : vector<2x1x8x8xi32> to vector<2x8x8xi32>
    %c0_i32 = arith.constant 0 : i32
    %6 = vector.broadcast %c0_i32 : i32 to vector<2x8x8xi32>
    %7 = arith.cmpi eq, %5, %6 : vector<2x8x8xi32>
    %cst = arith.constant -1.000000e+09 : f32
    %cst_9 = arith.constant 0.000000e+00 : f32
    %8 = vector.broadcast %cst : f32 to vector<2x8x8xf32>
    %9 = vector.broadcast %cst_9 : f32 to vector<2x8x8xf32>
    %10 = arith.select %7, %8, %9 : vector<2x8x8xi1>, vector<2x8x8xf32>
    %c0_10 = arith.constant 0 : index
    %c0_11 = arith.constant 0 : index
    %c0_12 = arith.constant 0 : index
    %c0_13 = arith.constant 0 : index
    %11 = vector.load %arg3[%c0_10, %c0_11, %c0_12, %c0_13] : memref<2x1x1x8xi32, #tpu.memory_space<vmem>>, vector<2x1x1x8xi32>
    %12 = vector.shape_cast %11 : vector<2x1x1x8xi32> to vector<2x1x8xi32>
    %c0_i32_14 = arith.constant 0 : i32
    %13 = vector.broadcast %c0_i32_14 : i32 to vector<2x1x8xi32>
    %14 = arith.cmpi eq, %12, %13 : vector<2x1x8xi32>
    %cst_15 = arith.constant -1.000000e+09 : f32
    %cst_16 = arith.constant 0.000000e+00 : f32
    %15 = vector.broadcast %cst_15 : f32 to vector<2x1x8xf32>
    %16 = vector.broadcast %cst_16 : f32 to vector<2x1x8xf32>
    %17 = arith.select %14, %15, %16 : vector<2x1x8xi1>, vector<2x1x8xf32>
    %c0_17 = arith.constant 0 : index
    %c0_18 = arith.constant 0 : index
    %18 = vector.load %arg14[%c0_17, %c0_18] : memref<1x32xf32, #tpu.memory_space<vmem>>, vector<1x32xf32>
    %c0_19 = arith.constant 0 : index
    %c0_20 = arith.constant 0 : index
    %19 = vector.load %arg15[%c0_19, %c0_20] : memref<1x32xf32, #tpu.memory_space<vmem>>, vector<1x32xf32>
    %cst_21 = arith.constant dense<0.000000e+00> : vector<16xf32>
    %20 = vector.multi_reduction <add>, %1, %cst_21 [1] : vector<16x32xf32> to vector<16xf32>
    %21 = vector.shape_cast %20 : vector<16xf32> to vector<16x1xf32>
    %cst_22 = arith.constant 3.200000e+01 : f32
    %22 = vector.broadcast %cst_22 : f32 to vector<16x1xf32>
    %23 = arith.divf %21, %22 : vector<16x1xf32>
    %24 = vector.broadcast %23 : vector<16x1xf32> to vector<16x32xf32>
    %25 = arith.subf %1, %24 : vector<16x32xf32>
    %26 = arith.mulf %25, %25 : vector<16x32xf32>
    %cst_23 = arith.constant dense<0.000000e+00> : vector<16xf32>
    %27 = vector.multi_reduction <add>, %26, %cst_23 [1] : vector<16x32xf32> to vector<16xf32>
    %28 = vector.shape_cast %27 : vector<16xf32> to vector<16x1xf32>
    %cst_24 = arith.constant 0.0322580636 : f32
    %29 = vector.broadcast %cst_24 : f32 to vector<16x1xf32>
    %30 = arith.mulf %28, %29 : vector<16x1xf32>
    %31 = math.sqrt %30 : vector<16x1xf32>
    %cst_25 = arith.constant 9.99999997E-7 : f32
    %32 = vector.broadcast %cst_25 : f32 to vector<16x1xf32>
    %33 = arith.addf %31, %32 : vector<16x1xf32>
    %34 = vector.broadcast %33 : vector<16x1xf32> to vector<16x32xf32>
    %35 = arith.divf %25, %34 : vector<16x32xf32>
    %36 = vector.broadcast %18 : vector<1x32xf32> to vector<16x32xf32>
    %37 = arith.mulf %36, %35 : vector<16x32xf32>
    %38 = vector.broadcast %19 : vector<1x32xf32> to vector<16x32xf32>
    %39 = arith.addf %37, %38 : vector<16x32xf32>
    %c0_26 = arith.constant 0 : index
    %c0_27 = arith.constant 0 : index
    %40 = vector.load %arg5[%c0_26, %c0_27] : memref<32x96xf32, #tpu.memory_space<vmem>>, vector<32x96xf32>
    %cst_28 = arith.constant dense<0.000000e+00> : vector<16x96xf32>
    %41 = tpu.matmul %39, %40, %cst_28 {dimension_numbers = #tpu.dot_dimension_numbers<[1], [0], [0], [1], [0, 0, 1, 1], [], []>} : vector<16x32xf32>, vector<32x96xf32>, vector<16x96xf32> -> vector<16x96xf32>
    %42 = vector.extract_strided_slice %41 {offsets = [0, 0], sizes = [16, 32], strides = [1, 1]} : vector<16x96xf32> to vector<16x32xf32>
    %43 = vector.extract_strided_slice %41 {offsets = [0, 32], sizes = [16, 32], strides = [1, 1]} : vector<16x96xf32> to vector<16x32xf32>
    %44 = vector.extract_strided_slice %41 {offsets = [0, 64], sizes = [16, 32], strides = [1, 1]} : vector<16x96xf32> to vector<16x32xf32>
    %c0_29 = arith.constant 0 : index
    %c0_30 = arith.constant 0 : index
    %45 = vector.load %arg6[%c0_29, %c0_30] : memref<32x32xf32, #tpu.memory_space<vmem>>, vector<32x32xf32>
    %46 = vector.shape_cast %42 : vector<16x32xf32> to vector<2x8x32xf32>
    %47 = vector.shape_cast %43 : vector<16x32xf32> to vector<2x8x32xf32>
    %48 = vector.shape_cast %44 : vector<16x32xf32> to vector<2x8x32xf32>
    %49 = vector.extract_strided_slice %46 {offsets = [0, 0, 0], sizes = [2, 8, 8], strides = [1, 1, 1]} : vector<2x8x32xf32> to vector<2x8x8xf32>
    %50 = vector.extract_strided_slice %47 {offsets = [0, 0, 0], sizes = [2, 8, 8], strides = [1, 1, 1]} : vector<2x8x32xf32> to vector<2x8x8xf32>
    "tpu.trace_start"() <{level = 10 : i32, message = "bqd,bkd->bqk"}> : () -> ()
    %cst_31 = arith.constant dense<0.000000e+00> : vector<2x8x8xf32>
    %51 = tpu.matmul %49, %50, %cst_31 {dimension_numbers = #tpu.dot_dimension_numbers<[2], [2], [1], [1], [0, 0, 0, 1, 1, 1], [0], [0]>} : vector<2x8x8xf32>, vector<2x8x8xf32>, vector<2x8x8xf32> -> vector<2x8x8xf32>
    "tpu.trace_stop"() : () -> ()
    %52 = arith.addf %51, %10 : vector<2x8x8xf32>
    %cst_32 = arith.constant dense<0xFF800000> : vector<2x8xf32>
    %53 = vector.multi_reduction <maximumf>, %52, %cst_32 [2] : vector<2x8x8xf32> to vector<2x8xf32>
    %54 = vector.shape_cast %53 : vector<2x8xf32> to vector<2x8x1xf32>
    %55 = vector.broadcast %54 : vector<2x8x1xf32> to vector<2x8x8xf32>
    %56 = arith.subf %52, %55 : vector<2x8x8xf32>
    %57 = math.exp %56 : vector<2x8x8xf32>
    %cst_33 = arith.constant dense<0.000000e+00> : vector<2x8xf32>
    %58 = vector.multi_reduction <add>, %57, %cst_33 [2] : vector<2x8x8xf32> to vector<2x8xf32>
    %59 = vector.shape_cast %58 : vector<2x8xf32> to vector<2x8x1xf32>
    %60 = tpu.reciprocal %59 {approx = true} : vector<2x8x1xf32> -> vector<2x8x1xf32>
    %61 = vector.broadcast %60 : vector<2x8x1xf32> to vector<2x8x8xf32>
    %62 = arith.mulf %57, %61 : vector<2x8x8xf32>
    %63 = vector.extract_strided_slice %48 {offsets = [0, 0, 0], sizes = [2, 8, 8], strides = [1, 1, 1]} : vector<2x8x32xf32> to vector<2x8x8xf32>
    "tpu.trace_start"() <{level = 10 : i32, message = "bqk,bkd->bqd"}> : () -> ()
    %cst_34 = arith.constant dense<0.000000e+00> : vector<2x8x8xf32>
    %64 = tpu.matmul %62, %63, %cst_34 {dimension_numbers = #tpu.dot_dimension_numbers<[2], [1], [1], [2], [0, 0, 0, 1, 1, 2], [0], [0]>} : vector<2x8x8xf32>, vector<2x8x8xf32>, vector<2x8x8xf32> -> vector<2x8x8xf32>
    "tpu.trace_stop"() : () -> ()
    %65 = vector.shape_cast %64 : vector<2x8x8xf32> to vector<16x8xf32>
    %c0_35 = arith.constant 0 : index
    %c0_36 = arith.constant 0 : index
    %66 = vector.load %arg21[%c0_35, %c0_36] : memref<16x32xf32, #tpu.memory_space<vmem>>, vector<16x8xf32>
    tpu.vector_store %arg21[%c0_35, %c0_36], %65 {strides = array<i32>} : memref<16x32xf32, #tpu.memory_space<vmem>>, vector<16x8xf32>,
    %67 = vector.extract_strided_slice %46 {offsets = [0, 0, 8], sizes = [2, 8, 8], strides = [1, 1, 1]} : vector<2x8x32xf32> to vector<2x8x8xf32>
    %68 = vector.extract_strided_slice %47 {offsets = [0, 0, 8], sizes = [2, 8, 8], strides = [1, 1, 1]} : vector<2x8x32xf32> to vector<2x8x8xf32>
    "tpu.trace_start"() <{level = 10 : i32, message = "bqd,bkd->bqk"}> : () -> ()
    %cst_37 = arith.constant dense<0.000000e+00> : vector<2x8x8xf32>
    %69 = tpu.matmul %67, %68, %cst_37 {dimension_numbers = #tpu.dot_dimension_numbers<[2], [2], [1], [1], [0, 0, 0, 1, 1, 1], [0], [0]>} : vector<2x8x8xf32>, vector<2x8x8xf32>, vector<2x8x8xf32> -> vector<2x8x8xf32>
    "tpu.trace_stop"() : () -> ()
    %70 = arith.addf %69, %10 : vector<2x8x8xf32>
    %cst_38 = arith.constant dense<0xFF800000> : vector<2x8xf32>
    %71 = vector.multi_reduction <maximumf>, %70, %cst_38 [2] : vector<2x8x8xf32> to vector<2x8xf32>
    %72 = vector.shape_cast %71 : vector<2x8xf32> to vector<2x8x1xf32>
    %73 = vector.broadcast %72 : vector<2x8x1xf32> to vector<2x8x8xf32>
    %74 = arith.subf %70, %73 : vector<2x8x8xf32>
    %75 = math.exp %74 : vector<2x8x8xf32>
    %cst_39 = arith.constant dense<0.000000e+00> : vector<2x8xf32>
    %76 = vector.multi_reduction <add>, %75, %cst_39 [2] : vector<2x8x8xf32> to vector<2x8xf32>
    %77 = vector.shape_cast %76 : vector<2x8xf32> to vector<2x8x1xf32>
    %78 = tpu.reciprocal %77 {approx = true} : vector<2x8x1xf32> -> vector<2x8x1xf32>
    %79 = vector.broadcast %78 : vector<2x8x1xf32> to vector<2x8x8xf32>
    %80 = arith.mulf %75, %79 : vector<2x8x8xf32>
    %81 = vector.extract_strided_slice %48 {offsets = [0, 0, 8], sizes = [2, 8, 8], strides = [1, 1, 1]} : vector<2x8x32xf32> to vector<2x8x8xf32>
    "tpu.trace_start"() <{level = 10 : i32, message = "bqk,bkd->bqd"}> : () -> ()
    %cst_40 = arith.constant dense<0.000000e+00> : vector<2x8x8xf32>
    %82 = tpu.matmul %80, %81, %cst_40 {dimension_numbers = #tpu.dot_dimension_numbers<[2], [1], [1], [2], [0, 0, 0, 1, 1, 2], [0], [0]>} : vector<2x8x8xf32>, vector<2x8x8xf32>, vector<2x8x8xf32> -> vector<2x8x8xf32>
    "tpu.trace_stop"() : () -> ()
    %83 = vector.shape_cast %82 : vector<2x8x8xf32> to vector<16x8xf32>
    %c0_41 = arith.constant 0 : index
    %c8 = arith.constant 8 : index
    %84 = vector.load %arg21[%c0_41, %c8] : memref<16x32xf32, #tpu.memory_space<vmem>>, vector<16x8xf32>
    tpu.vector_store %arg21[%c0_41, %c8], %83 {strides = array<i32>} : memref<16x32xf32, #tpu.memory_space<vmem>>, vector<16x8xf32>,
    %85 = vector.extract_strided_slice %46 {offsets = [0, 0, 16], sizes = [2, 8, 8], strides = [1, 1, 1]} : vector<2x8x32xf32> to vector<2x8x8xf32>
    %86 = vector.extract_strided_slice %47 {offsets = [0, 0, 16], sizes = [2, 8, 8], strides = [1, 1, 1]} : vector<2x8x32xf32> to vector<2x8x8xf32>
    "tpu.trace_start"() <{level = 10 : i32, message = "bqd,bkd->bqk"}> : () -> ()
    %cst_42 = arith.constant dense<0.000000e+00> : vector<2x8x8xf32>
    %87 = tpu.matmul %85, %86, %cst_42 {dimension_numbers = #tpu.dot_dimension_numbers<[2], [2], [1], [1], [0, 0, 0, 1, 1, 1], [0], [0]>} : vector<2x8x8xf32>, vector<2x8x8xf32>, vector<2x8x8xf32> -> vector<2x8x8xf32>
    "tpu.trace_stop"() : () -> ()
    %88 = arith.addf %87, %10 : vector<2x8x8xf32>
    %cst_43 = arith.constant dense<0xFF800000> : vector<2x8xf32>
    %89 = vector.multi_reduction <maximumf>, %88, %cst_43 [2] : vector<2x8x8xf32> to vector<2x8xf32>
    %90 = vector.shape_cast %89 : vector<2x8xf32> to vector<2x8x1xf32>
    %91 = vector.broadcast %90 : vector<2x8x1xf32> to vector<2x8x8xf32>
    %92 = arith.subf %88, %91 : vector<2x8x8xf32>
    %93 = math.exp %92 : vector<2x8x8xf32>
    %cst_44 = arith.constant dense<0.000000e+00> : vector<2x8xf32>
    %94 = vector.multi_reduction <add>, %93, %cst_44 [2] : vector<2x8x8xf32> to vector<2x8xf32>
    %95 = vector.shape_cast %94 : vector<2x8xf32> to vector<2x8x1xf32>
    %96 = tpu.reciprocal %95 {approx = true} : vector<2x8x1xf32> -> vector<2x8x1xf32>
    %97 = vector.broadcast %96 : vector<2x8x1xf32> to vector<2x8x8xf32>
    %98 = arith.mulf %93, %97 : vector<2x8x8xf32>
    %99 = vector.extract_strided_slice %48 {offsets = [0, 0, 16], sizes = [2, 8, 8], strides = [1, 1, 1]} : vector<2x8x32xf32> to vector<2x8x8xf32>
    "tpu.trace_start"() <{level = 10 : i32, message = "bqk,bkd->bqd"}> : () -> ()
    %cst_45 = arith.constant dense<0.000000e+00> : vector<2x8x8xf32>
    %100 = tpu.matmul %98, %99, %cst_45 {dimension_numbers = #tpu.dot_dimension_numbers<[2], [1], [1], [2], [0, 0, 0, 1, 1, 2], [0], [0]>} : vector<2x8x8xf32>, vector<2x8x8xf32>, vector<2x8x8xf32> -> vector<2x8x8xf32>
    "tpu.trace_stop"() : () -> ()
    %101 = vector.shape_cast %100 : vector<2x8x8xf32> to vector<16x8xf32>
    %c0_46 = arith.constant 0 : index
    %c16 = arith.constant 16 : index
    %102 = vector.load %arg21[%c0_46, %c16] : memref<16x32xf32, #tpu.memory_space<vmem>>, vector<16x8xf32>
    tpu.vector_store %arg21[%c0_46, %c16], %101 {strides = array<i32>} : memref<16x32xf32, #tpu.memory_space<vmem>>, vector<16x8xf32>,
    %103 = vector.extract_strided_slice %46 {offsets = [0, 0, 24], sizes = [2, 8, 8], strides = [1, 1, 1]} : vector<2x8x32xf32> to vector<2x8x8xf32>
    %104 = vector.extract_strided_slice %47 {offsets = [0, 0, 24], sizes = [2, 8, 8], strides = [1, 1, 1]} : vector<2x8x32xf32> to vector<2x8x8xf32>
    "tpu.trace_start"() <{level = 10 : i32, message = "bqd,bkd->bqk"}> : () -> ()
    %cst_47 = arith.constant dense<0.000000e+00> : vector<2x8x8xf32>
    %105 = tpu.matmul %103, %104, %cst_47 {dimension_numbers = #tpu.dot_dimension_numbers<[2], [2], [1], [1], [0, 0, 0, 1, 1, 1], [0], [0]>} : vector<2x8x8xf32>, vector<2x8x8xf32>, vector<2x8x8xf32> -> vector<2x8x8xf32>
    "tpu.trace_stop"() : () -> ()
    %106 = arith.addf %105, %10 : vector<2x8x8xf32>
    %cst_48 = arith.constant dense<0xFF800000> : vector<2x8xf32>
    %107 = vector.multi_reduction <maximumf>, %106, %cst_48 [2] : vector<2x8x8xf32> to vector<2x8xf32>
    %108 = vector.shape_cast %107 : vector<2x8xf32> to vector<2x8x1xf32>
    %109 = vector.broadcast %108 : vector<2x8x1xf32> to vector<2x8x8xf32>
    %110 = arith.subf %106, %109 : vector<2x8x8xf32>
    %111 = math.exp %110 : vector<2x8x8xf32>
    %cst_49 = arith.constant dense<0.000000e+00> : vector<2x8xf32>
    %112 = vector.multi_reduction <add>, %111, %cst_49 [2] : vector<2x8x8xf32> to vector<2x8xf32>
    %113 = vector.shape_cast %112 : vector<2x8xf32> to vector<2x8x1xf32>
    %114 = tpu.reciprocal %113 {approx = true} : vector<2x8x1xf32> -> vector<2x8x1xf32>
    %115 = vector.broadcast %114 : vector<2x8x1xf32> to vector<2x8x8xf32>
    %116 = arith.mulf %111, %115 : vector<2x8x8xf32>
    %117 = vector.extract_strided_slice %48 {offsets = [0, 0, 24], sizes = [2, 8, 8], strides = [1, 1, 1]} : vector<2x8x32xf32> to vector<2x8x8xf32>
    "tpu.trace_start"() <{level = 10 : i32, message = "bqk,bkd->bqd"}> : () -> ()
    %cst_50 = arith.constant dense<0.000000e+00> : vector<2x8x8xf32>
    %118 = tpu.matmul %116, %117, %cst_50 {dimension_numbers = #tpu.dot_dimension_numbers<[2], [1], [1], [2], [0, 0, 0, 1, 1, 2], [0], [0]>} : vector<2x8x8xf32>, vector<2x8x8xf32>, vector<2x8x8xf32> -> vector<2x8x8xf32>
    "tpu.trace_stop"() : () -> ()
    %119 = vector.shape_cast %118 : vector<2x8x8xf32> to vector<16x8xf32>
    %c0_51 = arith.constant 0 : index
    %c24 = arith.constant 24 : index
    %120 = vector.load %arg21[%c0_51, %c24] : memref<16x32xf32, #tpu.memory_space<vmem>>, vector<16x8xf32>
    tpu.vector_store %arg21[%c0_51, %c24], %119 {strides = array<i32>} : memref<16x32xf32, #tpu.memory_space<vmem>>, vector<16x8xf32>,
    %c0_52 = arith.constant 0 : index
    %c0_53 = arith.constant 0 : index
    %121 = vector.load %arg21[%c0_52, %c0_53] : memref<16x32xf32, #tpu.memory_space<vmem>>, vector<16x32xf32>
    %cst_54 = arith.constant dense<0.000000e+00> : vector<16x32xf32>
    %122 = tpu.matmul %121, %45, %cst_54 {dimension_numbers = #tpu.dot_dimension_numbers<[1], [0], [0], [1], [0, 0, 1, 1], [], []>} : vector<16x32xf32>, vector<32x32xf32>, vector<16x32xf32> -> vector<16x32xf32>
    %123 = arith.addf %1, %122 : vector<16x32xf32>
    %c0_55 = arith.constant 0 : index
    %c0_56 = arith.constant 0 : index
    %124 = vector.load %arg16[%c0_55, %c0_56] : memref<1x32xf32, #tpu.memory_space<vmem>>, vector<1x32xf32>
    %c0_57 = arith.constant 0 : index
    %c0_58 = arith.constant 0 : index
    %125 = vector.load %arg17[%c0_57, %c0_58] : memref<1x32xf32, #tpu.memory_space<vmem>>, vector<1x32xf32>
    %cst_59 = arith.constant dense<0.000000e+00> : vector<16xf32>
    %126 = vector.multi_reduction <add>, %123, %cst_59 [1] : vector<16x32xf32> to vector<16xf32>
    %127 = vector.shape_cast %126 : vector<16xf32> to vector<16x1xf32>
    %cst_60 = arith.constant 3.200000e+01 : f32
    %128 = vector.broadcast %cst_60 : f32 to vector<16x1xf32>
    %129 = arith.divf %127, %128 : vector<16x1xf32>
    %130 = vector.broadcast %129 : vector<16x1xf32> to vector<16x32xf32>
    %131 = arith.subf %123, %130 : vector<16x32xf32>
    %132 = arith.mulf %131, %131 : vector<16x32xf32>
    %cst_61 = arith.constant dense<0.000000e+00> : vector<16xf32>
    %133 = vector.multi_reduction <add>, %132, %cst_61 [1] : vector<16x32xf32> to vector<16xf32>
    %134 = vector.shape_cast %133 : vector<16xf32> to vector<16x1xf32>
    %cst_62 = arith.constant 0.0322580636 : f32
    %135 = vector.broadcast %cst_62 : f32 to vector<16x1xf32>
    %136 = arith.mulf %134, %135 : vector<16x1xf32>
    %137 = math.sqrt %136 : vector<16x1xf32>
    %cst_63 = arith.constant 9.99999997E-7 : f32
    %138 = vector.broadcast %cst_63 : f32 to vector<16x1xf32>
    %139 = arith.addf %137, %138 : vector<16x1xf32>
    %140 = vector.broadcast %139 : vector<16x1xf32> to vector<16x32xf32>
    %141 = arith.divf %131, %140 : vector<16x32xf32>
    %142 = vector.broadcast %124 : vector<1x32xf32> to vector<16x32xf32>
    %143 = arith.mulf %142, %141 : vector<16x32xf32>
    %144 = vector.broadcast %125 : vector<1x32xf32> to vector<16x32xf32>
    %145 = arith.addf %143, %144 : vector<16x32xf32>
    %c0_64 = arith.constant 0 : index
    %c0_65 = arith.constant 0 : index
    %146 = vector.load %arg7[%c0_64, %c0_65] : memref<32x32xf32, #tpu.memory_space<vmem>>, vector<32x32xf32>
    %cst_66 = arith.constant dense<0.000000e+00> : vector<16x32xf32>
    %147 = tpu.matmul %145, %146, %cst_66 {dimension_numbers = #tpu.dot_dimension_numbers<[1], [0], [0], [1], [0, 0, 1, 1], [], []>} : vector<16x32xf32>, vector<32x32xf32>, vector<16x32xf32> -> vector<16x32xf32>
    %c0_67 = arith.constant 0 : index
    %c0_68 = arith.constant 0 : index
    %148 = vector.load %arg8[%c0_67, %c0_68] : memref<32x64xf32, #tpu.memory_space<vmem>>, vector<32x64xf32>
    %cst_69 = arith.constant dense<0.000000e+00> : vector<16x64xf32>
    %149 = tpu.matmul %3, %148, %cst_69 {dimension_numbers = #tpu.dot_dimension_numbers<[1], [0], [0], [1], [0, 0, 1, 1], [], []>} : vector<16x32xf32>, vector<32x64xf32>, vector<16x64xf32> -> vector<16x64xf32>
    %150 = vector.extract_strided_slice %149 {offsets = [0, 0], sizes = [16, 32], strides = [1, 1]} : vector<16x64xf32> to vector<16x32xf32>
    %151 = vector.extract_strided_slice %149 {offsets = [0, 32], sizes = [16, 32], strides = [1, 1]} : vector<16x64xf32> to vector<16x32xf32>
    %c0_70 = arith.constant 0 : index
    %c0_71 = arith.constant 0 : index
    %152 = vector.load %arg9[%c0_70, %c0_71] : memref<32x32xf32, #tpu.memory_space<vmem>>, vector<32x32xf32>
    %153 = vector.shape_cast %147 : vector<16x32xf32> to vector<2x8x32xf32>
    %154 = vector.shape_cast %150 : vector<16x32xf32> to vector<2x8x32xf32>
    %155 = vector.shape_cast %151 : vector<16x32xf32> to vector<2x8x32xf32>
    %156 = vector.extract_strided_slice %153 {offsets = [0, 0, 0], sizes = [2, 8, 8], strides = [1, 1, 1]} : vector<2x8x32xf32> to vector<2x8x8xf32>
    %157 = vector.extract_strided_slice %154 {offsets = [0, 0, 0], sizes = [2, 8, 8], strides = [1, 1, 1]} : vector<2x8x32xf32> to vector<2x8x8xf32>
    "tpu.trace_start"() <{level = 10 : i32, message = "bqd,bkd->bqk"}> : () -> ()
    %cst_72 = arith.constant dense<0.000000e+00> : vector<2x8x8xf32>
    %158 = tpu.matmul %156, %157, %cst_72 {dimension_numbers = #tpu.dot_dimension_numbers<[2], [2], [1], [1], [0, 0, 0, 1, 1, 1], [0], [0]>} : vector<2x8x8xf32>, vector<2x8x8xf32>, vector<2x8x8xf32> -> vector<2x8x8xf32>
    "tpu.trace_stop"() : () -> ()
    %159 = vector.broadcast %17 : vector<2x1x8xf32> to vector<2x8x8xf32>
    %160 = arith.addf %158, %159 : vector<2x8x8xf32>
    %cst_73 = arith.constant dense<0xFF800000> : vector<2x8xf32>
    %161 = vector.multi_reduction <maximumf>, %160, %cst_73 [2] : vector<2x8x8xf32> to vector<2x8xf32>
    %162 = vector.shape_cast %161 : vector<2x8xf32> to vector<2x8x1xf32>
    %163 = vector.broadcast %162 : vector<2x8x1xf32> to vector<2x8x8xf32>
    %164 = arith.subf %160, %163 : vector<2x8x8xf32>
    %165 = math.exp %164 : vector<2x8x8xf32>
    %cst_74 = arith.constant dense<0.000000e+00> : vector<2x8xf32>
    %166 = vector.multi_reduction <add>, %165, %cst_74 [2] : vector<2x8x8xf32> to vector<2x8xf32>
    %167 = vector.shape_cast %166 : vector<2x8xf32> to vector<2x8x1xf32>
    %168 = tpu.reciprocal %167 {approx = true} : vector<2x8x1xf32> -> vector<2x8x1xf32>
    %169 = vector.broadcast %168 : vector<2x8x1xf32> to vector<2x8x8xf32>
    %170 = arith.mulf %165, %169 : vector<2x8x8xf32>
    %171 = vector.extract_strided_slice %155 {offsets = [0, 0, 0], sizes = [2, 8, 8], strides = [1, 1, 1]} : vector<2x8x32xf32> to vector<2x8x8xf32>
    "tpu.trace_start"() <{level = 10 : i32, message = "bqk,bkd->bqd"}> : () -> ()
    %cst_75 = arith.constant dense<0.000000e+00> : vector<2x8x8xf32>
    %172 = tpu.matmul %170, %171, %cst_75 {dimension_numbers = #tpu.dot_dimension_numbers<[2], [1], [1], [2], [0, 0, 0, 1, 1, 2], [0], [0]>} : vector<2x8x8xf32>, vector<2x8x8xf32>, vector<2x8x8xf32> -> vector<2x8x8xf32>
    "tpu.trace_stop"() : () -> ()
    %173 = vector.shape_cast %172 : vector<2x8x8xf32> to vector<16x8xf32>
    %c0_76 = arith.constant 0 : index
    %c0_77 = arith.constant 0 : index
    %174 = vector.load %arg21[%c0_76, %c0_77] : memref<16x32xf32, #tpu.memory_space<vmem>>, vector<16x8xf32>
    tpu.vector_store %arg21[%c0_76, %c0_77], %173 {strides = array<i32>} : memref<16x32xf32, #tpu.memory_space<vmem>>, vector<16x8xf32>,
    %175 = vector.extract_strided_slice %153 {offsets = [0, 0, 8], sizes = [2, 8, 8], strides = [1, 1, 1]} : vector<2x8x32xf32> to vector<2x8x8xf32>
    %176 = vector.extract_strided_slice %154 {offsets = [0, 0, 8], sizes = [2, 8, 8], strides = [1, 1, 1]} : vector<2x8x32xf32> to vector<2x8x8xf32>
    "tpu.trace_start"() <{level = 10 : i32, message = "bqd,bkd->bqk"}> : () -> ()
    %cst_78 = arith.constant dense<0.000000e+00> : vector<2x8x8xf32>
    %177 = tpu.matmul %175, %176, %cst_78 {dimension_numbers = #tpu.dot_dimension_numbers<[2], [2], [1], [1], [0, 0, 0, 1, 1, 1], [0], [0]>} : vector<2x8x8xf32>, vector<2x8x8xf32>, vector<2x8x8xf32> -> vector<2x8x8xf32>
    "tpu.trace_stop"() : () -> ()
    %178 = vector.broadcast %17 : vector<2x1x8xf32> to vector<2x8x8xf32>
    %179 = arith.addf %177, %178 : vector<2x8x8xf32>
    %cst_79 = arith.constant dense<0xFF800000> : vector<2x8xf32>
    %180 = vector.multi_reduction <maximumf>, %179, %cst_79 [2] : vector<2x8x8xf32> to vector<2x8xf32>
    %181 = vector.shape_cast %180 : vector<2x8xf32> to vector<2x8x1xf32>
    %182 = vector.broadcast %181 : vector<2x8x1xf32> to vector<2x8x8xf32>
    %183 = arith.subf %179, %182 : vector<2x8x8xf32>
    %184 = math.exp %183 : vector<2x8x8xf32>
    %cst_80 = arith.constant dense<0.000000e+00> : vector<2x8xf32>
    %185 = vector.multi_reduction <add>, %184, %cst_80 [2] : vector<2x8x8xf32> to vector<2x8xf32>
    %186 = vector.shape_cast %185 : vector<2x8xf32> to vector<2x8x1xf32>
    %187 = tpu.reciprocal %186 {approx = true} : vector<2x8x1xf32> -> vector<2x8x1xf32>
    %188 = vector.broadcast %187 : vector<2x8x1xf32> to vector<2x8x8xf32>
    %189 = arith.mulf %184, %188 : vector<2x8x8xf32>
    %190 = vector.extract_strided_slice %155 {offsets = [0, 0, 8], sizes = [2, 8, 8], strides = [1, 1, 1]} : vector<2x8x32xf32> to vector<2x8x8xf32>
    "tpu.trace_start"() <{level = 10 : i32, message = "bqk,bkd->bqd"}> : () -> ()
    %cst_81 = arith.constant dense<0.000000e+00> : vector<2x8x8xf32>
    %191 = tpu.matmul %189, %190, %cst_81 {dimension_numbers = #tpu.dot_dimension_numbers<[2], [1], [1], [2], [0, 0, 0, 1, 1, 2], [0], [0]>} : vector<2x8x8xf32>, vector<2x8x8xf32>, vector<2x8x8xf32> -> vector<2x8x8xf32>
    "tpu.trace_stop"() : () -> ()
    %192 = vector.shape_cast %191 : vector<2x8x8xf32> to vector<16x8xf32>
    %c0_82 = arith.constant 0 : index
    %c8_83 = arith.constant 8 : index
    %193 = vector.load %arg21[%c0_82, %c8_83] : memref<16x32xf32, #tpu.memory_space<vmem>>, vector<16x8xf32>
    tpu.vector_store %arg21[%c0_82, %c8_83], %192 {strides = array<i32>} : memref<16x32xf32, #tpu.memory_space<vmem>>, vector<16x8xf32>,
    %194 = vector.extract_strided_slice %153 {offsets = [0, 0, 16], sizes = [2, 8, 8], strides = [1, 1, 1]} : vector<2x8x32xf32> to vector<2x8x8xf32>
    %195 = vector.extract_strided_slice %154 {offsets = [0, 0, 16], sizes = [2, 8, 8], strides = [1, 1, 1]} : vector<2x8x32xf32> to vector<2x8x8xf32>
    "tpu.trace_start"() <{level = 10 : i32, message = "bqd,bkd->bqk"}> : () -> ()
    %cst_84 = arith.constant dense<0.000000e+00> : vector<2x8x8xf32>
    %196 = tpu.matmul %194, %195, %cst_84 {dimension_numbers = #tpu.dot_dimension_numbers<[2], [2], [1], [1], [0, 0, 0, 1, 1, 1], [0], [0]>} : vector<2x8x8xf32>, vector<2x8x8xf32>, vector<2x8x8xf32> -> vector<2x8x8xf32>
    "tpu.trace_stop"() : () -> ()
    %197 = vector.broadcast %17 : vector<2x1x8xf32> to vector<2x8x8xf32>
    %198 = arith.addf %196, %197 : vector<2x8x8xf32>
    %cst_85 = arith.constant dense<0xFF800000> : vector<2x8xf32>
    %199 = vector.multi_reduction <maximumf>, %198, %cst_85 [2] : vector<2x8x8xf32> to vector<2x8xf32>
    %200 = vector.shape_cast %199 : vector<2x8xf32> to vector<2x8x1xf32>
    %201 = vector.broadcast %200 : vector<2x8x1xf32> to vector<2x8x8xf32>
    %202 = arith.subf %198, %201 : vector<2x8x8xf32>
    %203 = math.exp %202 : vector<2x8x8xf32>
    %cst_86 = arith.constant dense<0.000000e+00> : vector<2x8xf32>
    %204 = vector.multi_reduction <add>, %203, %cst_86 [2] : vector<2x8x8xf32> to vector<2x8xf32>
    %205 = vector.shape_cast %204 : vector<2x8xf32> to vector<2x8x1xf32>
    %206 = tpu.reciprocal %205 {approx = true} : vector<2x8x1xf32> -> vector<2x8x1xf32>
    %207 = vector.broadcast %206 : vector<2x8x1xf32> to vector<2x8x8xf32>
    %208 = arith.mulf %203, %207 : vector<2x8x8xf32>
    %209 = vector.extract_strided_slice %155 {offsets = [0, 0, 16], sizes = [2, 8, 8], strides = [1, 1, 1]} : vector<2x8x32xf32> to vector<2x8x8xf32>
    "tpu.trace_start"() <{level = 10 : i32, message = "bqk,bkd->bqd"}> : () -> ()
    %cst_87 = arith.constant dense<0.000000e+00> : vector<2x8x8xf32>
    %210 = tpu.matmul %208, %209, %cst_87 {dimension_numbers = #tpu.dot_dimension_numbers<[2], [1], [1], [2], [0, 0, 0, 1, 1, 2], [0], [0]>} : vector<2x8x8xf32>, vector<2x8x8xf32>, vector<2x8x8xf32> -> vector<2x8x8xf32>
    "tpu.trace_stop"() : () -> ()
    %211 = vector.shape_cast %210 : vector<2x8x8xf32> to vector<16x8xf32>
    %c0_88 = arith.constant 0 : index
    %c16_89 = arith.constant 16 : index
    %212 = vector.load %arg21[%c0_88, %c16_89] : memref<16x32xf32, #tpu.memory_space<vmem>>, vector<16x8xf32>
    tpu.vector_store %arg21[%c0_88, %c16_89], %211 {strides = array<i32>} : memref<16x32xf32, #tpu.memory_space<vmem>>, vector<16x8xf32>,
    %213 = vector.extract_strided_slice %153 {offsets = [0, 0, 24], sizes = [2, 8, 8], strides = [1, 1, 1]} : vector<2x8x32xf32> to vector<2x8x8xf32>
    %214 = vector.extract_strided_slice %154 {offsets = [0, 0, 24], sizes = [2, 8, 8], strides = [1, 1, 1]} : vector<2x8x32xf32> to vector<2x8x8xf32>
    "tpu.trace_start"() <{level = 10 : i32, message = "bqd,bkd->bqk"}> : () -> ()
    %cst_90 = arith.constant dense<0.000000e+00> : vector<2x8x8xf32>
    %215 = tpu.matmul %213, %214, %cst_90 {dimension_numbers = #tpu.dot_dimension_numbers<[2], [2], [1], [1], [0, 0, 0, 1, 1, 1], [0], [0]>} : vector<2x8x8xf32>, vector<2x8x8xf32>, vector<2x8x8xf32> -> vector<2x8x8xf32>
    "tpu.trace_stop"() : () -> ()
    %216 = vector.broadcast %17 : vector<2x1x8xf32> to vector<2x8x8xf32>
    %217 = arith.addf %215, %216 : vector<2x8x8xf32>
    %cst_91 = arith.constant dense<0xFF800000> : vector<2x8xf32>
    %218 = vector.multi_reduction <maximumf>, %217, %cst_91 [2] : vector<2x8x8xf32> to vector<2x8xf32>
    %219 = vector.shape_cast %218 : vector<2x8xf32> to vector<2x8x1xf32>
    %220 = vector.broadcast %219 : vector<2x8x1xf32> to vector<2x8x8xf32>
    %221 = arith.subf %217, %220 : vector<2x8x8xf32>
    %222 = math.exp %221 : vector<2x8x8xf32>
    %cst_92 = arith.constant dense<0.000000e+00> : vector<2x8xf32>
    %223 = vector.multi_reduction <add>, %222, %cst_92 [2] : vector<2x8x8xf32> to vector<2x8xf32>
    %224 = vector.shape_cast %223 : vector<2x8xf32> to vector<2x8x1xf32>
    %225 = tpu.reciprocal %224 {approx = true} : vector<2x8x1xf32> -> vector<2x8x1xf32>
    %226 = vector.broadcast %225 : vector<2x8x1xf32> to vector<2x8x8xf32>
    %227 = arith.mulf %222, %226 : vector<2x8x8xf32>
    %228 = vector.extract_strided_slice %155 {offsets = [0, 0, 24], sizes = [2, 8, 8], strides = [1, 1, 1]} : vector<2x8x32xf32> to vector<2x8x8xf32>
    "tpu.trace_start"() <{level = 10 : i32, message = "bqk,bkd->bqd"}> : () -> ()
    %cst_93 = arith.constant dense<0.000000e+00> : vector<2x8x8xf32>
    %229 = tpu.matmul %227, %228, %cst_93 {dimension_numbers = #tpu.dot_dimension_numbers<[2], [1], [1], [2], [0, 0, 0, 1, 1, 2], [0], [0]>} : vector<2x8x8xf32>, vector<2x8x8xf32>, vector<2x8x8xf32> -> vector<2x8x8xf32>
    "tpu.trace_stop"() : () -> ()
    %230 = vector.shape_cast %229 : vector<2x8x8xf32> to vector<16x8xf32>
    %c0_94 = arith.constant 0 : index
    %c24_95 = arith.constant 24 : index
    %231 = vector.load %arg21[%c0_94, %c24_95] : memref<16x32xf32, #tpu.memory_space<vmem>>, vector<16x8xf32>
    tpu.vector_store %arg21[%c0_94, %c24_95], %230 {strides = array<i32>} : memref<16x32xf32, #tpu.memory_space<vmem>>, vector<16x8xf32>,
    %c0_96 = arith.constant 0 : index
    %c0_97 = arith.constant 0 : index
    %232 = vector.load %arg21[%c0_96, %c0_97] : memref<16x32xf32, #tpu.memory_space<vmem>>, vector<16x32xf32>
    %cst_98 = arith.constant dense<0.000000e+00> : vector<16x32xf32>
    %233 = tpu.matmul %232, %152, %cst_98 {dimension_numbers = #tpu.dot_dimension_numbers<[1], [0], [0], [1], [0, 0, 1, 1], [], []>} : vector<16x32xf32>, vector<32x32xf32>, vector<16x32xf32> -> vector<16x32xf32>
    %234 = arith.addf %123, %233 : vector<16x32xf32>
    %c0_99 = arith.constant 0 : index
    %c0_100 = arith.constant 0 : index
    %235 = vector.load %arg18[%c0_99, %c0_100] : memref<1x32xf32, #tpu.memory_space<vmem>>, vector<1x32xf32>
    %c0_101 = arith.constant 0 : index
    %c0_102 = arith.constant 0 : index
    %236 = vector.load %arg19[%c0_101, %c0_102] : memref<1x32xf32, #tpu.memory_space<vmem>>, vector<1x32xf32>
    %cst_103 = arith.constant dense<0.000000e+00> : vector<16xf32>
    %237 = vector.multi_reduction <add>, %234, %cst_103 [1] : vector<16x32xf32> to vector<16xf32>
    %238 = vector.shape_cast %237 : vector<16xf32> to vector<16x1xf32>
    %cst_104 = arith.constant 3.200000e+01 : f32
    %239 = vector.broadcast %cst_104 : f32 to vector<16x1xf32>
    %240 = arith.divf %238, %239 : vector<16x1xf32>
    %241 = vector.broadcast %240 : vector<16x1xf32> to vector<16x32xf32>
    %242 = arith.subf %234, %241 : vector<16x32xf32>
    %243 = arith.mulf %242, %242 : vector<16x32xf32>
    %cst_105 = arith.constant dense<0.000000e+00> : vector<16xf32>
    %244 = vector.multi_reduction <add>, %243, %cst_105 [1] : vector<16x32xf32> to vector<16xf32>
    %245 = vector.shape_cast %244 : vector<16xf32> to vector<16x1xf32>
    %cst_106 = arith.constant 0.0322580636 : f32
    %246 = vector.broadcast %cst_106 : f32 to vector<16x1xf32>
    %247 = arith.mulf %245, %246 : vector<16x1xf32>
    %248 = math.sqrt %247 : vector<16x1xf32>
    %cst_107 = arith.constant 9.99999997E-7 : f32
    %249 = vector.broadcast %cst_107 : f32 to vector<16x1xf32>
    %250 = arith.addf %248, %249 : vector<16x1xf32>
    %251 = vector.broadcast %250 : vector<16x1xf32> to vector<16x32xf32>
    %252 = arith.divf %242, %251 : vector<16x32xf32>
    %253 = vector.broadcast %235 : vector<1x32xf32> to vector<16x32xf32>
    %254 = arith.mulf %253, %252 : vector<16x32xf32>
    %255 = vector.broadcast %236 : vector<1x32xf32> to vector<16x32xf32>
    %256 = arith.addf %254, %255 : vector<16x32xf32>
    %c0_108 = arith.constant 0 : index
    %c0_109 = arith.constant 0 : index
    %257 = vector.load %arg10[%c0_108, %c0_109] : memref<32x64xf32, #tpu.memory_space<vmem>>, vector<32x64xf32>
    %cst_110 = arith.constant dense<0.000000e+00> : vector<16x64xf32>
    %258 = tpu.matmul %256, %257, %cst_110 {dimension_numbers = #tpu.dot_dimension_numbers<[1], [0], [0], [1], [0, 0, 1, 1], [], []>} : vector<16x32xf32>, vector<32x64xf32>, vector<16x64xf32> -> vector<16x64xf32>
    %c0_111 = arith.constant 0 : index
    %c0_112 = arith.constant 0 : index
    %259 = vector.load %arg11[%c0_111, %c0_112] : memref<1x64xf32, #tpu.memory_space<vmem>>, vector<1x64xf32>
    %260 = vector.broadcast %259 : vector<1x64xf32> to vector<16x64xf32>
    %261 = arith.addf %258, %260 : vector<16x64xf32>
    %cst_113 = arith.constant 0.000000e+00 : f32
    %262 = vector.broadcast %cst_113 : f32 to vector<16x64xf32>
    %263 = arith.maximumf %261, %262 : vector<16x64xf32>
    %c0_114 = arith.constant 0 : index
    %c0_115 = arith.constant 0 : index
    %264 = vector.load %arg12[%c0_114, %c0_115] : memref<64x32xf32, #tpu.memory_space<vmem>>, vector<64x32xf32>
    %cst_116 = arith.constant dense<0.000000e+00> : vector<16x32xf32>
    %265 = tpu.matmul %263, %264, %cst_116 {dimension_numbers = #tpu.dot_dimension_numbers<[1], [0], [0], [1], [0, 0, 1, 1], [], []>} : vector<16x64xf32>, vector<64x32xf32>, vector<16x32xf32> -> vector<16x32xf32>
    %266 = arith.addf %234, %265 : vector<16x32xf32>
    %c0_117 = arith.constant 0 : index
    %c0_118 = arith.constant 0 : index
    %267 = vector.load %arg13[%c0_117, %c0_118] : memref<1x32xf32, #tpu.memory_space<vmem>>, vector<1x32xf32>
    %268 = vector.broadcast %267 : vector<1x32xf32> to vector<16x32xf32>
    %269 = arith.addf %266, %268 : vector<16x32xf32>
    %270 = vector.shape_cast %269 : vector<16x32xf32> to vector<2x8x32xf32>
    %c0_119 = arith.constant 0 : index
    %c0_120 = arith.constant 0 : index
    %c0_121 = arith.constant 0 : index
    %271 = vector.load %arg20[%c0_119, %c0_120, %c0_121] : memref<2x8x32xf32, #tpu.memory_space<vmem>>, vector<2x8x32xf32>
    tpu.vector_store %arg20[%c0_119, %c0_120, %c0_121], %270 {strides = array<i32>} : memref<2x8x32xf32, #tpu.memory_space<vmem>>, vector<2x8x32xf32>,
    return
  }
  func.func @transform_0(%arg0: i32) -> (i32, i32, i32) {
    %c0_i32 = arith.constant 0 : i32
    %c0_i32_0 = arith.constant 0 : i32
    %c0_i32_1 = arith.constant 0 : i32
    return %arg0, %c0_i32, %c0_i32_0 : i32, i32, i32
  }
  func.func @transform_1(%arg0: i32) -> (i32, i32, i32) {
    %c0_i32 = arith.constant 0 : i32
    %c0_i32_0 = arith.constant 0 : i32
    %c0_i32_1 = arith.constant 0 : i32
    return %arg0, %c0_i32, %c0_i32_0 : i32, i32, i32
  }
  func.func @transform_2(%arg0: i32) -> (i32, i32, i32, i32) {
    %c0_i32 = arith.constant 0 : i32
    %c0_i32_0 = arith.constant 0 : i32
    %c0_i32_1 = arith.constant 0 : i32
    %c0_i32_2 = arith.constant 0 : i32
    return %arg0, %c0_i32, %c0_i32_0, %c0_i32_1 : i32, i32, i32, i32
  }
  func.func @transform_3(%arg0: i32) -> (i32, i32, i32, i32) {
    %c0_i32 = arith.constant 0 : i32
    %c0_i32_0 = arith.constant 0 : i32
    %c0_i32_1 = arith.constant 0 : i32
    %c0_i32_2 = arith.constant 0 : i32
    return %arg0, %c0_i32, %c0_i32_0, %c0_i32_1 : i32, i32, i32, i32
  }
  func.func @transform_4(%arg0: i32) -> (i32, i32) {
    %c0_i32 = arith.constant 0 : i32
    %c0_i32_0 = arith.constant 0 : i32
    %c0_i32_1 = arith.constant 0 : i32
    return %c0_i32, %c0_i32_0 : i32, i32
  }
  func.func @transform_5(%arg0: i32) -> (i32, i32) {
    %c0_i32 = arith.constant 0 : i32
    %c0_i32_0 = arith.constant 0 : i32
    %c0_i32_1 = arith.constant 0 : i32
    return %c0_i32, %c0_i32_0 : i32, i32
  }
  func.func @transform_6(%arg0: i32) -> (i32, i32) {
    %c0_i32 = arith.constant 0 : i32
    %c0_i32_0 = arith.constant 0 : i32
    %c0_i32_1 = arith.constant 0 : i32
    return %c0_i32, %c0_i32_0 : i32, i32
  }
  func.func @transform_7(%arg0: i32) -> (i32, i32) {
    %c0_i32 = arith.constant 0 : i32
    %c0_i32_0 = arith.constant 0 : i32
    %c0_i32_1 = arith.constant 0 : i32
    return %c0_i32, %c0_i32_0 : i32, i32
  }
  func.func @transform_8(%arg0: i32) -> (i32, i32) {
    %c0_i32 = arith.constant 0 : i32
    %c0_i32_0 = arith.constant 0 : i32
    %c0_i32_1 = arith.constant 0 : i32
    return %c0_i32, %c0_i32_0 : i32, i32
  }
  func.func @transform_9(%arg0: i32) -> (i32, i32) {
    %c0_i32 = arith.constant 0 : i32
    %c0_i32_0 = arith.constant 0 : i32
    %c0_i32_1 = arith.constant 0 : i32
    return %c0_i32, %c0_i32_0 : i32, i32
  }
  func.func @transform_10(%arg0: i32) -> (i32, i32) {
    %c0_i32 = arith.constant 0 : i32
    %c0_i32_0 = arith.constant 0 : i32
    %c0_i32_1 = arith.constant 0 : i32
    return %c0_i32, %c0_i32_0 : i32, i32
  }
  func.func @transform_11(%arg0: i32) -> (i32, i32) {
    %c0_i32 = arith.constant 0 : i32
    %c0_i32_0 = arith.constant 0 : i32
    %c0_i32_1 = arith.constant 0 : i32
    return %c0_i32, %c0_i32_0 : i32, i32
  }
  func.func @transform_12(%arg0: i32) -> (i32, i32) {
    %c0_i32 = arith.constant 0 : i32
    %c0_i32_0 = arith.constant 0 : i32
    %c0_i32_1 = arith.constant 0 : i32
    return %c0_i32, %c0_i32_0 : i32, i32
  }
  func.func @transform_13(%arg0: i32) -> (i32, i32) {
    %c0_i32 = arith.constant 0 : i32
    %c0_i32_0 = arith.constant 0 : i32
    %c0_i32_1 = arith.constant 0 : i32
    return %c0_i32, %c0_i32_0 : i32, i32
  }
  func.func @transform_14(%arg0: i32) -> (i32, i32) {
    %c0_i32 = arith.constant 0 : i32
    %c0_i32_0 = arith.constant 0 : i32
    %c0_i32_1 = arith.constant 0 : i32
    return %c0_i32, %c0_i32_0 : i32, i32
  }
  func.func @transform_15(%arg0: i32) -> (i32, i32) {
    %c0_i32 = arith.constant 0 : i32
    %c0_i32_0 = arith.constant 0 : i32
    %c0_i32_1 = arith.constant 0 : i32
    return %c0_i32, %c0_i32_0 : i32, i32
  }
  func.func @transform_16(%arg0: i32) -> (i32, i32) {
    %c0_i32 = arith.constant 0 : i32
    %c0_i32_0 = arith.constant 0 : i32
    %c0_i32_1 = arith.constant 0 : i32
    return %c0_i32, %c0_i32_0 : i32, i32
  }
  func.func @transform_17(%arg0: i32) -> (i32, i32) {
    %c0_i32 = arith.constant 0 : i32
    %c0_i32_0 = arith.constant 0 : i32
    %c0_i32_1 = arith.constant 0 : i32
    return %c0_i32, %c0_i32_0 : i32, i32
  }
  func.func @transform_18(%arg0: i32) -> (i32, i32) {
    %c0_i32 = arith.constant 0 : i32
    %c0_i32_0 = arith.constant 0 : i32
    %c0_i32_1 = arith.constant 0 : i32
    return %c0_i32, %c0_i32_0 : i32, i32
  }
  func.func @transform_19(%arg0: i32) -> (i32, i32, i32) {
    %c0_i32 = arith.constant 0 : i32
    %c0_i32_0 = arith.constant 0 : i32
    %c0_i32_1 = arith.constant 0 : i32
    return %arg0, %c0_i32, %c0_i32_0 : i32, i32, i32
  }
}

</mosaic_0001>

<bundles_post_ra>
// kernel: tpu_custom_call.1
= control target key start
LH: loop header
LB: loop body
LE: loop exit
PB: predicated region body
PF: predicated region fallthrough
CT: control target
= control target key end

     0   :  { %s5048_s0 = inlined_call_operand.hbm [shape: f32[2,8,32], index: 0, kind: input, shape index: {}]   ;;  %s5049_s1 = inlined_call_operand.hbm [shape: f32[2,8,32], index: 1, kind: input, shape index: {}]   ;;  %s5050_s2 = inlined_call_operand.vmem [shape: s32[2,1,1,8], index: 2, kind: input, shape index: {}]   ;;  %s5051_s3 = inlined_call_operand.hbm [shape: s32[2,1,8,8], index: 3, kind: input, shape index: {}]   ;;  %s5052_s4 = inlined_call_operand.vmem [shape: f32[32,96], index: 4, kind: input, shape index: {}]   ;;  %s5053_s5 = inlined_call_operand.vmem [shape: f32[32,32], index: 5, kind: input, shape index: {}]   ;;  %s5054_s6 = inlined_call_operand.vmem [shape: f32[32,32], index: 6, kind: input, shape index: {}]   ;;  %s5055_s7 = inlined_call_operand.hbm [shape: f32[32,64], index: 7, kind: input, shape index: {}]   ;;  %s5056_s8 = inlined_call_operand.hbm [shape: f32[32,32], index: 8, kind: input, shape index: {}]   ;;  %s5057_s9 = inlined_call_operand.hbm [shape: f32[32,64], index: 9, kind: input, shape index: {}]   ;;  %s5058_s10 = inlined_call_operand.vmem [shape: f32[1,64], index: 10, kind: input, shape index: {}]   ;;  %s5059_s11 = inlined_call_operand.vmem [shape: f32[64,32], index: 11, kind: input, shape index: {}]   ;;  %s5060_s12 = inlined_call_operand.vmem [shape: f32[1,32], index: 12, kind: input, shape index: {}]   ;;  %s5061_s13 = inlined_call_operand.vmem [shape: f32[1,32], index: 13, kind: input, shape index: {}]   ;;  %s5062_s14 = inlined_call_operand.vmem [shape: f32[1,32], index: 14, kind: input, shape index: {}]   ;;  %s5063_s15 = inlined_call_operand.vmem [shape: f32[1,32], index: 15, kind: input, shape index: {}]   ;;  %s5064_s16 = inlined_call_operand.vmem [shape: f32[1,32], index: 16, kind: input, shape index: {}]   ;;  %s5065_s17 = inlined_call_operand.vmem [shape: f32[1,32], index: 17, kind: input, shape index: {}]   ;;  %s5066_s18 = inlined_call_operand.vmem [shape: f32[1,32], index: 18, kind: input, shape index: {}]   ;;  %s5067_s19 = inlined_call_operand.hbm [shape: f32[2,8,32], index: 19, kind: output, shape index: {}]  }
   0x1   :  { %5069 = sst [smem:[#allocation20_spill]] %s5048_s0 }
   0x2   :  { %5070 = sst [smem:[#allocation21_spill]] %s5049_s1 }
   0x3   :  { %5071 = sst [smem:[#allocation22_spill]] %s5050_s2 }
   0x4   :  { %5072 = sst [smem:[#allocation23_spill]] %s5051_s3 }
   0x5   :  { %24 = vsyncpa [#allocation4], 0 }
   0x6   :  { %25 = vsyncpa [#allocation7], 0 }
   0x7   :  { %26 = vsyncpa [#allocation10], 0 }
   0x8   :  { %27 = vsyncpa [#allocation13], 0 }
   0x9   :  { %28 = vsyncpa [#allocation5], 0  ;;  %s4388_s0 = smov [#allocation6]   ;;  %s4389_s20 = smov [#allocation9]  }
   0xa   :  { %s46_s30 = sshll.u32 %s4388_s0, 4  ;;  %s78_s21 = sshll.u32 %s4389_s20, 4  ;;  %s47_s30 = int_to_ptr.vmem [resolvable:$true] %s46_s30  ;;  %s79_s21 = int_to_ptr.vmem [resolvable:$true] %s78_s21 }
   0xb   :  { %s4246_s1 = scalar_lea.vmem %s47_s30, 256  ;;  %p4251_p1 = scmp.lt.s32.totalorder %s47_s30, %s47_s30 }
   0xc   :  { %p4247_p0 = scmp.ne.s32.totalorder %s47_s30, %s4246_s1  ;;  %p4252_p2 = scmp.lt.s32.totalorder %s4246_s1, %s4246_s1 }
   0xe   :  { %p4253_p3 = por %p4252_p2, %p4251_p1 }
  0x10   :  { %p4254_p4 = pnand %p4253_p3, %p4247_p0 }
  0x12   :  { %4257 = shalt.err (!%p4254_p4)
}
  0x13   :  { %s4390_s22 = smov 128   ;;  %s4391_s2 = smov 8  }
  0x14   :  { %s5073_s25 = sld [smem:[#allocation21_spill]]  ;;  %s4266_s3 = scalar_lea.vmem %s79_s21, 512 }
  0x15   :  { %p4267_p5 = scmp.ne.s32.totalorder %s79_s21, %s4266_s3  ;;  %p4271_p6 = scmp.lt.s32.totalorder %s79_s21, %s79_s21 }
  0x16   :  { %p4272_p7 = scmp.lt.s32.totalorder %s4266_s3, %s4266_s3 }
  0x18   :  { %p4273_p8 = por %p4272_p7, %p4271_p6 }
  0x1a   :  { %52 = dma.hbm_to_vmem [thread:$0]  %s5073_s25, 256, %s47_s30, [#allocation7], %s4390_s22, %s4390_s22, %s4391_s2  }
  0x1b   :  { %p4274_p9 = pnand %p4273_p8, %p4267_p5 }
  0x1d   :  { %4277 = shalt.err (!%p4274_p9)
}
  0x1e   :  { %84 = dma.hbm_to_vmem [thread:$0]  %s5055_s7, 512, %s79_s21, [#allocation10], %s4390_s22, %s4390_s22, %s4391_s2  }
  0x1f   :  { %s4392_s28 = smov [#allocation3]   ;;  %s4393_s0 = smov [#allocation8]  }
  0x20   :  { %s34_s29 = sshll.u32 %s4392_s28, 4  ;;  %s60_s20 = sshll.u32 %s4393_s0, 4  ;;  %s35_s29 = int_to_ptr.vmem [resolvable:$true] %s34_s29  ;;  %s61_s20 = int_to_ptr.vmem [resolvable:$true] %s60_s20 }
  0x21   :  { %s4286_s30 = scalar_lea.vmem %s35_s29, 256  ;;  %p4291_p11 = scmp.lt.s32.totalorder %s35_s29, %s35_s29 }
  0x22   :  { %p4287_p10 = scmp.ne.s32.totalorder %s35_s29, %s4286_s30  ;;  %p4292_p12 = scmp.lt.s32.totalorder %s4286_s30, %s4286_s30 }
  0x24   :  { %p4293_p13 = por %p4292_p12, %p4291_p11 }
  0x26   :  { %p4294_p0 = pnand %p4293_p13, %p4287_p10 }
  0x28   :  { %4297 = shalt.err (!%p4294_p0)
}
  0x29   :  { %s5074_s24 = sld [smem:[#allocation20_spill]]  ;;  %s4306_s7 = scalar_lea.vmem %s61_s20, 256 }
  0x2a   :  { %p4307_p1 = scmp.ne.s32.totalorder %s61_s20, %s4306_s7  ;;  %p4311_p2 = scmp.lt.s32.totalorder %s61_s20, %s61_s20 }
  0x2b   :  { %p4312_p3 = scmp.lt.s32.totalorder %s4306_s7, %s4306_s7 }
  0x2d   :  { %p4313_p4 = por %p4312_p3, %p4311_p2 }
  0x2f   :  { %40 = dma.hbm_to_vmem [thread:$0]  %s5074_s24, 256, %s35_s29, [#allocation4], %s4390_s22, %s4390_s22, %s4391_s2  }
  0x30   :  { %p4314_p5 = pnand %p4313_p4, %p4307_p1 }
  0x32   :  { %4317 = shalt.err (!%p4314_p5)
}
  0x33   :  { %s5075_s3 = sld [smem:[#allocation23_spill]]  ;;  %s4394_s26 = smov [#allocation11]  }
  0x34   :  { %s90_s27 = sshll.u32 %s4394_s26, 4  ;;  %s4395_s28 = smov [#allocation12]   ;;  %s91_s27 = int_to_ptr.vmem [resolvable:$true] %s90_s27 }
  0x35   :  { %s102_s0 = sshll.u32 %s4395_s28, 4  ;;  %s4326_s29 = scalar_lea.vmem %s91_s27, 512  ;;  %s103_s0 = int_to_ptr.vmem [resolvable:$true] %s102_s0 }
  0x36   :  { %p4327_p6 = scmp.ne.s32.totalorder %s91_s27, %s4326_s29  ;;  %p4331_p7 = scmp.lt.s32.totalorder %s91_s27, %s91_s27 }
  0x37   :  { %p4332_p8 = scmp.lt.s32.totalorder %s4326_s29, %s4326_s29 }
  0x39   :  { %66 = dma.hbm_to_vmem [thread:$0]  %s5075_s3, 256, %s61_s20, [#allocation7], %s4390_s22, %s4390_s22, %s4391_s2  }
  0x3a   :  { %p4333_p9 = por %p4332_p8, %p4331_p7 }
  0x3c   :  { %p4334_p10 = pnand %p4333_p9, %p4327_p6 }
  0x3e   :  { %4337 = shalt.err (!%p4334_p10)
}
  0x3f   :  { %96 = dma.hbm_to_vmem [thread:$0]  %s5056_s8, 512, %s91_s27, [#allocation10], %s4390_s22, %s4390_s22, %s4391_s2  }
  0x40   :  { %s4346_s20 = scalar_lea.vmem %s103_s0, 512  ;;  %p4351_p12 = scmp.lt.s32.totalorder %s103_s0, %s103_s0 }
  0x41   :  { %p4347_p11 = scmp.ne.s32.totalorder %s103_s0, %s4346_s20  ;;  %p4352_p13 = scmp.lt.s32.totalorder %s4346_s20, %s4346_s20 }
  0x43   :  { %p4353_p0 = por %p4352_p13, %p4351_p12 }
  0x45   :  { %p4354_p1 = pnand %p4353_p0, %p4347_p11 }
  0x47   :  { %4357 = shalt.err (!%p4354_p1)
}
  0x48   :  { %108 = dma.hbm_to_vmem [thread:$0]  %s5057_s9, 512, %s103_s0, [#allocation13], %s4390_s22, %s4390_s22, %s4391_s2  }
  0x49   :  { %4378 = dma.done.wait [#allocation4], 256  }
  0x4a   :  { %4379 = vsyncadd [#allocation4], 4294967040 }
  0x4b   :  { %4380 = dma.done.wait [#allocation7], 512  }
  0x4c   :  { %4381 = vsyncadd [#allocation7], 4294966784 }
  0x4d   :  { %4382 = dma.done.wait [#allocation10], 1024  }
  0x4e   :  { %4383 = vsyncadd [#allocation10], 4294966272 }
  0x4f   :  { %4384 = dma.done.wait [#allocation13], 512  }
  0x50   :  { %4385 = vsyncadd [#allocation13], 4294966784  ;;  %vm163_vm0 = vcmask 261120   ;;  %v4548_v0 = vld [vmem:[#allocation6] sm:$0xff]  ;;  %v4550_v1 = vld [vmem:[#allocation6 + $0x8] sm:$0xff]  ;;  %v4396_v44 = vmov 0.0  }
  0x51   :  { %v164_v2 = vsel %vm163_vm0, %v4548_v0, 0.0  ;;  %v167_v3 = vsel %vm163_vm0, %v4550_v1, 0.0  ;;  %v224_v14 = vld [vmem:[%s5052_s4 + $0x18] sm:$0xff]  ;;  %v223_v15 = vld [vmem:[%s5052_s4 + $0x10] sm:$0xff]  ;;  %v222_v16 = vld [vmem:[%s5052_s4 + $0x8] sm:$0xff]  ;;  %3902 = vmatprep.subr.mxu0 %v4396_v44  ;;  %vm4397_vm5 = vmmov 0  }
  0x52   :  { %165 = vadd.xlane.f32.xlu0 %v164_v2  ;;  %3881 = vmatprep.subr.mxu1 %v224_v14  ;;  %v221_v17 = vld [vmem:[%s5052_s4] sm:$0xff]  ;;  %vm313_vm6 = vcmask 64512   ;;  %v149_v49 = vld [vmem:[#allocation8] sm:$0xff]  ;;  %v150_v50 = vld [vmem:[#allocation8 + $0x8] sm:$0xff]  ;;  %s4400_s30 = smov 88   ;;  %s4401_s1 = smov 120  }
  0x53   :  { %3882 = vmatpush3.msra.mxu1 %v224_v14  ;;  %v3701_v35 = vld [vmem:[%s5061_s13] ss:$0 sm:$0xff]  ;;  %3904 = vmatprep.mubr.msk.f32.mxu0 %vm4397_vm5, %v4396_v44  ;;  %s4398_s13 = smov 96   ;;  %vm151_vm7 = vcmp.eq.s32.totalorder %v149_v49, 0  ;;  %vm152_vm8 = vcmp.eq.s32.totalorder %v150_v50, 0  ;;  %s4402_s20 = smov 56  }
  0x54   :  { %3883 = vmatprep.subr.mxu1 %v223_v15  ;;  %v3702_v37 = vld [vmem:[%s5062_s14] ss:$0 sm:$0xff]  ;;  %v4607_v51 = vsel %vm151_vm7, -1e+09, %v4396_v44  ;;  %v4611_v55 = vsel %vm152_vm8, -1e+09, %v4396_v44 }
  0x55   :  { %3884 = vmatpush3.msra.mxu1 %v223_v15  ;;  %s4399_s14 = smov 64   ;;  %s4403_s23 = smov 80   ;;  %vm979_vm9 = vcmask 130112   ;;  %vm1320_vm10 = vcmask 195712   ;;  %vm1661_vm11 = vcmask 261312   ;;  %vm3586_vm7 = vcmask 523264  }
  0x56   :  { %168 = vadd.xlane.f32.xlu0 %v167_v3  ;;  %3885 = vmatprep.subr.mxu1 %v222_v16  ;;  %s4404_s24 = smov 112   ;;  %s4405_s8 = smov 48  }
  0x57   :  { %3886 = vmatpush3.msra.mxu1 %v222_v16  ;;  %s4406_s9 = smov 72   ;;  %s4407_s7 = smov 104  }
  0x58   :  { %3887 = vmatprep.subr.mxu1 %v221_v17  ;;  %s4408_s21 = smov 40   ;;  %s4409_s25 = smov 16  }
  0x59   :  { %3888 = vmatpush3.msra.mxu1 %v221_v17 }
  0x5a   :  { %3892 = vmatprep.subr.mxu1 %v4396_v44 }
  0xdb   :  { %v166_v4 = vpop.xlane.xlu0 %165 }
  0xdc   :  { %v171_v5 = vmul.f32 0.03125, %v166_v4 }
  0xde   :  { %v173_v6 = vsub.f32 %v4548_v0, %v171_v5 }
  0xdf   :  { %v169_v7 = vpop.xlane.xlu0 %168 }
  0xe0   :  { %v172_v8 = vmul.f32 0.03125, %v169_v7  ;;  %v175_v9 = vmul.f32 %v173_v6, %v173_v6 }
  0xe2   :  { %v174_v10 = vsub.f32 %v4550_v1, %v172_v8  ;;  %v177_v11 = vsel %vm163_vm0, %v175_v9, 0.0 }
  0xe3   :  { %178 = vadd.xlane.f32.xlu1 %v177_v11 }
  0xe4   :  { %v176_v12 = vmul.f32 %v174_v10, %v174_v10 }
  0xe6   :  { %v180_v13 = vsel %vm163_vm0, %v176_v12, 0.0 }
  0xe7   :  { %181 = vadd.xlane.f32.xlu1 %v180_v13 }
 0x16c   :  { %v179_v18 = vpop.xlane.xlu1 %178 }
 0x16d   :  { %v183_v19 = vmul.f32 0.032258064, %v179_v18 }
 0x16f   :  { %4150 = vrsqrt.f32 %v183_v19  ;;  %vm187_vm1 = vcmp.eq.f32.partialorder %v183_v19, inf  ;;  %v190_v24 = vand.u32 2147483648, %v183_v19  ;;  %vm189_vm2 = vcmp.eq.f32.partialorder %v183_v19, 0.0 }
 0x170   :  { %v182_v20 = vpop.xlane.xlu1 %181 }
 0x171   :  { %v184_v21 = vmul.f32 0.032258064, %v182_v20 }
 0x173   :  { %4152 = vrsqrt.f32 %v184_v21  ;;  %vm194_vm3 = vcmp.eq.f32.partialorder %v184_v21, inf  ;;  %v197_v30 = vand.u32 2147483648, %v184_v21  ;;  %vm196_vm4 = vcmp.eq.f32.partialorder %v184_v21, 0.0 }
 0x17c   :  { %v4151_v22 = vpop.eup %4150 }
 0x17d   :  { %v186_v23 = vmul.f32 %v4151_v22, %v183_v19 }
 0x17f   :  { %v188_v25 = vsel %vm187_vm1, %v183_v19, %v186_v23 }
 0x180   :  { %v4153_v26 = vpop.eup %4152  ;;  %v191_v27 = vsel %vm189_vm2, %v190_v24, %v188_v25 }
 0x181   :  { %v193_v28 = vmul.f32 %v4153_v26, %v184_v21  ;;  %v199_v29 = vadd.f32 1e-06, %v191_v27 }
 0x183   :  { %v195_v31 = vsel %vm194_vm3, %v184_v21, %v193_v28  ;;  %4154 = vrcp.f32 %v199_v29 }
 0x184   :  { %v198_v32 = vsel %vm196_vm4, %v197_v30, %v195_v31 }
 0x185   :  { %v200_v33 = vadd.f32 1e-06, %v198_v32 }
 0x187   :  { %4156 = vrcp.f32 %v200_v33 }
 0x190   :  { %v4155_v34 = vpop.eup %4154 }
 0x191   :  { %v202_v36 = vmul.f32 %v4155_v34, %v173_v6 }
 0x193   :  { %v211_v38 = vmul.f32 %v3701_v35, %v202_v36 }
 0x194   :  { %v4157_v39 = vpop.eup %4156 }
 0x195   :  { %v204_v40 = vmul.f32 %v4157_v39, %v174_v10  ;;  %v219_v41 = vadd.f32 %v3702_v37, %v211_v38 }
 0x197   :  { %v212_v42 = vmul.f32 %v3701_v35, %v204_v40  ;;  %3889 = vmatprep.mubr.msk.f32.mxu1 %vm163_vm0, %v219_v41 }
 0x199   :  { %v220_v43 = vadd.f32 %v3702_v37, %v212_v42 }
 0x19b   :  { %3890 = vmatmul.mubr.msk.f32.vlgmr.msra.gmra.mxu1 %vm163_vm0, %v220_v43 }
 0x19c   :  { %3894 = vmatprep.mubr.msk.f32.mxu1 %vm4397_vm5, %v4396_v44 }
 0x25b   :  { %v4586_v45 = vpop.f32.mrf.mxu1 }
 0x25c   :  { %389 = vrot.lane.b32.xlu1 %v4586_v45, %s4398_s13 }
 0x25d   :  { %v4590_v46 = vpop.f32.mrf.mxu1 }
 0x25e   :  { %311 = vrot.lane.b32.xlu0 %v4590_v46, %s4398_s13 }
 0x2ce   :  { %v390_v48 = vpop.permute.xlu1 %389 }
 0x2d0   :  { %v312_v47 = vpop.permute.xlu0 %311 }
 0x2d1   :  { %3893 = vmatpush3.xpose.msk.msra.mxu1 %vm313_vm6, %v312_v47 }
 0x2d2   :  { %3897 = vmatprep.subr.mxu1 %v4396_v44 }
 0x2d4   :  { %3895 = vmatmul.mubr.msk.f32.vlgmr.msra.gmra.mxu1 %vm313_vm6, %v4590_v46 }
 0x2d5   :  { %3898 = vmatpush3.xpose.msk.msra.mxu1 %vm313_vm6, %v390_v48  ;;  %3899 = vmatprep.mubr.msk.f32.mxu1 %vm4397_vm5, %v4396_v44 }
 0x2d6   :  { %3907 = vmatprep.subr.mxu1 %v4396_v44 }
 0x2d8   :  { %3900 = vmatmul.mubr.msk.f32.vlgmr.msra.gmra.mxu1 %vm313_vm6, %v4586_v45 }
 0x2d9   :  { %3909 = vmatprep.mubr.msk.f32.mxu1 %vm4397_vm5, %v4396_v44 }
 0x394   :  { %v384_v52 = vpop.f32.mrf.mxu1 }
 0x395   :  { %v385_v53 = vadd.f32 %v384_v52, %v4607_v51 }
 0x396   :  { %v3896_v54 = vpop.f32.mrf.mxu1 }
 0x397   :  { %v465_v56 = vsel %vm313_vm6, %v385_v53, -inf }
 0x398   :  { %466 = vmax.xlane.f32.xlu1 %v465_v56  ;;  %v461_v57 = vpop.f32.mrf.mxu1 }
 0x399   :  { %v462_v58 = vadd.f32 %v461_v57, %v4611_v55 }
 0x39a   :  { %v3901_v59 = vpop.f32.mrf.mxu1 }
 0x39b   :  { %v468_v60 = vsel %vm313_vm6, %v462_v58, -inf }
 0x39c   :  { %469 = vmax.xlane.f32.xlu0 %v468_v60 }
 0x3a9   :  { %563 = vrot.lane.b32.xlu1 %v4586_v45, %s4399_s14 }
 0x3ad   :  { %643 = vrot.lane.b32.xlu1 %v4590_v46, %s4400_s30 }
 0x3b1   :  { %721 = vrot.lane.b32.xlu1 %v4586_v45, %s4400_s30 }
 0x421   :  { %v467_v61 = vpop.xlane.xlu1 %466 }
 0x422   :  { %v471_v62 = vsub.f32 %v385_v53, %v467_v61 }
 0x424   :  { %v473_v63 = vmul.f32 1.442695, %v471_v62 }
 0x425   :  { %v564_v2 = vpop.permute.xlu1 %563  ;;  %v470_v3 = vpop.xlane.xlu0 %469 }
 0x426   :  { %4158 = vpow2.f32 %v473_v63  ;;  %v472_v4 = vsub.f32 %v462_v58, %v470_v3  ;;  %3908 = vmatpush3.msra.mxu1 %v564_v2 }
 0x427   :  { %3917 = vmatprep.subr.mxu1 %v4396_v44 }
 0x428   :  { %v475_v5 = vmul.f32 1.442695, %v472_v4 }
 0x429   :  { %v644_v10 = vpop.permute.xlu1 %643 }
 0x42a   :  { %4160 = vpow2.f32 %v475_v5 }
 0x42d   :  { %v722_v11 = vpop.permute.xlu1 %721 }
 0x433   :  { %v4159_v6 = vpop.eup %4158 }
 0x434   :  { %v477_v7 = vsel %vm313_vm6, %v4159_v6, 0.0 }
 0x435   :  { %478 = vadd.xlane.f32.xlu0 %v477_v7 }
 0x437   :  { %v4161_v8 = vpop.eup %4160 }
 0x438   :  { %v480_v9 = vsel %vm313_vm6, %v4161_v8, 0.0 }
 0x439   :  { %481 = vadd.xlane.f32.xlu1 %v480_v9 }
 0x44a   :  { %719 = vrot.lane.b32.xlu1 %v4586_v45, %s4401_s1 }
 0x44b   :  { %487 = vrot.lane.b32.xlu0 %v4590_v46, %s4399_s14 }
 0x44f   :  { %641 = vrot.lane.b32.xlu0 %v4590_v46, %s4401_s1 }
 0x4be   :  { %v479_v12 = vpop.xlane.xlu0 %478 }
 0x4bf   :  { %4162 = vrcp.f32 %v479_v12 }
 0x4c2   :  { %v482_v13 = vpop.xlane.xlu1 %481  ;;  %v488_v14 = vpop.permute.xlu0 %487 }
 0x4c3   :  { %4164 = vrcp.f32 %v482_v13  ;;  %3903 = vmatpush3.msra.mxu0 %v488_v14 }
 0x4c4   :  { %3912 = vmatprep.subr.mxu0 %v4396_v44 }
 0x4c6   :  { %v642_v19 = vpop.permute.xlu0 %641  ;;  %v720_v20 = vpop.permute.xlu1 %719 }
 0x4cc   :  { %v4163_v15 = vpop.eup %4162 }
 0x4cd   :  { %v485_v16 = vmul.f32 %v4163_v15, %v4159_v6 }
 0x4cf   :  { %3905 = vmatmul.mubr.msk.f32.vlgmr.msra.gmra.mxu0 %vm313_vm6, %v485_v16 }
 0x4d0   :  { %v4165_v17 = vpop.eup %4164  ;;  %3913 = vmatpush3.xpose.msk.msra.mxu0 %vm313_vm6, %v644_v10  ;;  %3914 = vmatprep.mubr.msk.f32.mxu0 %vm4397_vm5, %v4396_v44 }
 0x4d1   :  { %v486_v18 = vmul.f32 %v4165_v17, %v4161_v8  ;;  %3922 = vmatprep.subr.mxu0 %v4396_v44 }
 0x4d3   :  { %3910 = vmatmul.mubr.msk.f32.vlgmr.msra.gmra.mxu1 %vm313_vm6, %v486_v18  ;;  %3915 = vmatmul.mubr.msk.f32.vlgmr.msra.gmra.mxu0 %vm313_vm6, %v642_v19 }
 0x4d4   :  { %3918 = vmatpush3.xpose.msk.msra.mxu1 %vm313_vm6, %v722_v11  ;;  %3919 = vmatprep.mubr.msk.f32.mxu1 %vm4397_vm5, %v4396_v44 }
 0x4d5   :  { %3927 = vmatprep.subr.mxu1 %v4396_v44  ;;  %3924 = vmatprep.mubr.msk.f32.mxu0 %vm4397_vm5, %v4396_v44 }
 0x4d7   :  { %3920 = vmatmul.mubr.msk.f32.vlgmr.msra.gmra.mxu1 %vm313_vm6, %v720_v20 }
 0x4d8   :  { %3929 = vmatprep.mubr.msk.f32.mxu1 %vm4397_vm5, %v4396_v44 }
 0x58f   :  { %v559_v21 = vpop.f32.mrf.mxu0 }
 0x590   :  { %639 = vst.msk [vmem:[#allocation2] sm:$0xff] %vm313_vm6, %v559_v21 }
 0x591   :  { %v3906_v22 = vpop.f32.mrf.mxu0 }
 0x593   :  { %v635_v23 = vpop.f32.mrf.mxu1  ;;  %v715_v24 = vpop.f32.mrf.mxu0 }
 0x594   :  { %640 = vst.msk [vmem:[#allocation2 + $0x8] sm:$0xff] %vm313_vm6, %v635_v23  ;;  %v716_v25 = vadd.f32 %v715_v24, %v4607_v51 }
 0x595   :  { %v3911_v26 = vpop.f32.mrf.mxu1  ;;  %v3916_v27 = vpop.f32.mrf.mxu0 }
 0x596   :  { %v797_v28 = vsel %vm313_vm6, %v716_v25, -inf }
 0x597   :  { %798 = vmax.xlane.f32.xlu0 %v797_v28  ;;  %v793_v29 = vpop.f32.mrf.mxu1 }
 0x598   :  { %v794_v30 = vadd.f32 %v793_v29, %v4611_v55 }
 0x599   :  { %v3921_v31 = vpop.f32.mrf.mxu1 }
 0x59a   :  { %v800_v32 = vsel %vm313_vm6, %v794_v30, -inf }
 0x59b   :  { %801 = vmax.xlane.f32.xlu1 %v800_v32 }
 0x5ac   :  { %895 = vrot.lane.b32.xlu1 %v4586_v45, %s4402_s20 }
 0x5ad   :  { %819 = vrot.lane.b32.xlu0 %v4590_v46, %s4402_s20  ;;  %s4410_s20 = smov 24  }
 0x5b0   :  { %984 = vrot.lane.b32.xlu1 %v4590_v46, %s4403_s23 }
 0x5b4   :  { %1062 = vrot.lane.b32.xlu1 %v4586_v45, %s4403_s23 }
 0x5b8   :  { %1060 = vrot.lane.b32.xlu1 %v4586_v45, %s4404_s24 }
 0x620   :  { %v799_v33 = vpop.xlane.xlu0 %798 }
 0x621   :  { %v803_v34 = vsub.f32 %v716_v25, %v799_v33 }
 0x623   :  { %v805_v35 = vmul.f32 1.442695, %v803_v34 }
 0x624   :  { %v820_v36 = vpop.permute.xlu0 %819  ;;  %v802_v37 = vpop.xlane.xlu1 %801 }
 0x625   :  { %4166 = vpow2.f32 %v805_v35  ;;  %v804_v38 = vsub.f32 %v794_v30, %v802_v37  ;;  %3923 = vmatpush3.msra.mxu0 %v820_v36 }
 0x626   :  { %3932 = vmatprep.subr.mxu0 %v4396_v44 }
 0x627   :  { %v807_v39 = vmul.f32 1.442695, %v804_v38 }
 0x628   :  { %v896_v40 = vpop.permute.xlu1 %895 }
 0x629   :  { %4168 = vpow2.f32 %v807_v39  ;;  %3928 = vmatpush3.msra.mxu1 %v896_v40 }
 0x62a   :  { %3937 = vmatprep.subr.mxu1 %v4396_v44 }
 0x62c   :  { %v985_v50 = vpop.permute.xlu1 %984 }
 0x630   :  { %v1063_v56 = vpop.permute.xlu1 %1062 }
 0x632   :  { %v4167_v41 = vpop.eup %4166 }
 0x633   :  { %v809_v42 = vsel %vm313_vm6, %v4167_v41, 0.0 }
 0x634   :  { %810 = vadd.xlane.f32.xlu0 %v809_v42  ;;  %v1061_v59 = vpop.permute.xlu1 %1060 }
 0x636   :  { %v4169_v43 = vpop.eup %4168 }
 0x637   :  { %v812_v47 = vsel %vm313_vm6, %v4169_v43, 0.0 }
 0x638   :  { %813 = vadd.xlane.f32.xlu0 %v812_v47 }
 0x64e   :  { %982 = vrot.lane.b32.xlu0 %v4590_v46, %s4404_s24 }
 0x6bd   :  { %v811_v48 = vpop.xlane.xlu0 %810 }
 0x6be   :  { %4170 = vrcp.f32 %v811_v48 }
 0x6c1   :  { %v814_v49 = vpop.xlane.xlu0 %813 }
 0x6c2   :  { %4172 = vrcp.f32 %v814_v49 }
 0x6c5   :  { %v983_v58 = vpop.permute.xlu0 %982 }
 0x6cb   :  { %v4171_v52 = vpop.eup %4170 }
 0x6cc   :  { %v817_v53 = vmul.f32 %v4171_v52, %v4167_v41 }
 0x6ce   :  { %3925 = vmatmul.mubr.msk.f32.vlgmr.msra.gmra.mxu0 %vm313_vm6, %v817_v53 }
 0x6cf   :  { %v4173_v54 = vpop.eup %4172  ;;  %3933 = vmatpush3.xpose.msk.msra.mxu0 %vm313_vm6, %v985_v50  ;;  %3934 = vmatprep.mubr.msk.f32.mxu0 %vm4397_vm5, %v4396_v44 }
 0x6d0   :  { %v818_v57 = vmul.f32 %v4173_v54, %v4169_v43  ;;  %3942 = vmatprep.subr.mxu0 %v4396_v44 }
 0x6d2   :  { %3930 = vmatmul.mubr.msk.f32.vlgmr.msra.gmra.mxu1 %vm313_vm6, %v818_v57  ;;  %3935 = vmatmul.mubr.msk.f32.vlgmr.msra.gmra.mxu0 %vm313_vm6, %v983_v58 }
 0x6d3   :  { %3938 = vmatpush3.xpose.msk.msra.mxu1 %vm313_vm6, %v1063_v56  ;;  %3939 = vmatprep.mubr.msk.f32.mxu1 %vm4397_vm5, %v4396_v44 }
 0x6d4   :  { %3947 = vmatprep.subr.mxu1 %v4396_v44  ;;  %3944 = vmatprep.mubr.msk.f32.mxu0 %vm4397_vm5, %v4396_v44 }
 0x6d6   :  { %3940 = vmatmul.mubr.msk.f32.vlgmr.msra.gmra.mxu1 %vm313_vm6, %v1061_v59 }
 0x6d7   :  { %3949 = vmatprep.mubr.msk.f32.mxu1 %vm4397_vm5, %v4396_v44 }
 0x78e   :  { %v4682_v60 = vpop.f32.mrf.mxu0 }
 0x790   :  { %v3926_v61 = vpop.f32.mrf.mxu0 }
 0x792   :  { %v4684_v62 = vpop.f32.mrf.mxu1  ;;  %v1056_v63 = vpop.f32.mrf.mxu0 }
 0x793   :  { %v1057_v2 = vadd.f32 %v1056_v63, %v4607_v51 }
 0x794   :  { %v3931_v3 = vpop.f32.mrf.mxu1  ;;  %v3936_v4 = vpop.f32.mrf.mxu0 }
 0x795   :  { %v1138_v5 = vsel %vm313_vm6, %v1057_v2, -inf }
 0x796   :  { %1139 = vmax.xlane.f32.xlu0 %v1138_v5  ;;  %v1134_v6 = vpop.f32.mrf.mxu1 }
 0x797   :  { %v1135_v7 = vadd.f32 %v1134_v6, %v4611_v55  ;;  %v308_v6 = vld [vmem:[%s5053_s5 + $0x10] sm:$0xff] }
 0x798   :  { %v3941_v8 = vpop.f32.mrf.mxu1 }
 0x799   :  { %v1141_v9 = vsel %vm313_vm6, %v1135_v7, -inf  ;;  %v306_v8 = vld [vmem:[%s5053_s5] sm:$0xff] }
 0x79a   :  { %1142 = vmax.xlane.f32.xlu1 %v1141_v9 }
 0x7ab   :  { %1236 = vrot.lane.b32.xlu1 %v4586_v45, %s4405_s8 }
 0x7ac   :  { %1160 = vrot.lane.b32.xlu0 %v4590_v46, %s4405_s8 }
 0x7af   :  { %1325 = vrot.lane.b32.xlu1 %v4590_v46, %s4406_s9 }
 0x7b3   :  { %1403 = vrot.lane.b32.xlu1 %v4586_v45, %s4406_s9 }
 0x7b7   :  { %1401 = vrot.lane.b32.xlu1 %v4586_v45, %s4407_s7 }
 0x81f   :  { %v1140_v10 = vpop.xlane.xlu0 %1139 }
 0x820   :  { %v1144_v11 = vsub.f32 %v1057_v2, %v1140_v10 }
 0x822   :  { %v1146_v12 = vmul.f32 1.442695, %v1144_v11 }
 0x823   :  { %v1161_v13 = vpop.permute.xlu0 %1160  ;;  %v1143_v14 = vpop.xlane.xlu1 %1142 }
 0x824   :  { %4174 = vpow2.f32 %v1146_v12  ;;  %v1145_v15 = vsub.f32 %v1135_v7, %v1143_v14  ;;  %3943 = vmatpush3.msra.mxu0 %v1161_v13  ;;  %v307_v7 = vld [vmem:[%s5053_s5 + $0x8] sm:$0xff] }
 0x825   :  { %3952 = vmatprep.subr.mxu0 %v4396_v44 }
 0x826   :  { %v1148_v16 = vmul.f32 1.442695, %v1145_v15 }
 0x827   :  { %v1237_v17 = vpop.permute.xlu1 %1236 }
 0x828   :  { %4176 = vpow2.f32 %v1148_v16  ;;  %3948 = vmatpush3.msra.mxu1 %v1237_v17 }
 0x829   :  { %3957 = vmatprep.subr.mxu1 %v4396_v44 }
 0x82b   :  { %v1326_v24 = vpop.permute.xlu1 %1325 }
 0x82f   :  { %v1404_v28 = vpop.permute.xlu1 %1403 }
 0x831   :  { %v4175_v18 = vpop.eup %4174 }
 0x832   :  { %v1150_v19 = vsel %vm313_vm6, %v4175_v18, 0.0 }
 0x833   :  { %1151 = vadd.xlane.f32.xlu0 %v1150_v19  ;;  %v1402_v31 = vpop.permute.xlu1 %1401 }
 0x835   :  { %v4177_v20 = vpop.eup %4176 }
 0x836   :  { %v1153_v21 = vsel %vm313_vm6, %v4177_v20, 0.0 }
 0x837   :  { %1154 = vadd.xlane.f32.xlu0 %v1153_v21 }
 0x84d   :  { %1323 = vrot.lane.b32.xlu0 %v4590_v46, %s4407_s7 }
 0x8bc   :  { %v1152_v22 = vpop.xlane.xlu0 %1151 }
 0x8bd   :  { %4178 = vrcp.f32 %v1152_v22 }
 0x8c0   :  { %v1155_v23 = vpop.xlane.xlu0 %1154 }
 0x8c1   :  { %4180 = vrcp.f32 %v1155_v23 }
 0x8c4   :  { %v1324_v30 = vpop.permute.xlu0 %1323 }
 0x8ca   :  { %v4179_v25 = vpop.eup %4178 }
 0x8cb   :  { %v1158_v26 = vmul.f32 %v4179_v25, %v4175_v18 }
 0x8cd   :  { %3945 = vmatmul.mubr.msk.f32.vlgmr.msra.gmra.mxu0 %vm313_vm6, %v1158_v26 }
 0x8ce   :  { %v4181_v27 = vpop.eup %4180  ;;  %3953 = vmatpush3.xpose.msk.msra.mxu0 %vm313_vm6, %v1326_v24  ;;  %3954 = vmatprep.mubr.msk.f32.mxu0 %vm4397_vm5, %v4396_v44 }
 0x8cf   :  { %v1159_v29 = vmul.f32 %v4181_v27, %v4177_v20  ;;  %3962 = vmatprep.subr.mxu0 %v4396_v44 }
 0x8d1   :  { %3950 = vmatmul.mubr.msk.f32.vlgmr.msra.gmra.mxu1 %vm313_vm6, %v1159_v29  ;;  %3955 = vmatmul.mubr.msk.f32.vlgmr.msra.gmra.mxu0 %vm313_vm6, %v1324_v30 }
 0x8d2   :  { %3958 = vmatpush3.xpose.msk.msra.mxu1 %vm313_vm6, %v1404_v28  ;;  %3959 = vmatprep.mubr.msk.f32.mxu1 %vm4397_vm5, %v4396_v44 }
 0x8d3   :  { %3967 = vmatprep.subr.mxu1 %v4396_v44  ;;  %3964 = vmatprep.mubr.msk.f32.mxu0 %vm4397_vm5, %v4396_v44 }
 0x8d5   :  { %3960 = vmatmul.mubr.msk.f32.vlgmr.msra.gmra.mxu1 %vm313_vm6, %v1402_v31  ;;  %v1895_v31 = vld [vmem:[#allocation9 + $0x18] sm:$0xff] }
 0x8d6   :  { %3969 = vmatprep.mubr.msk.f32.mxu1 %vm4397_vm5, %v4396_v44 }
 0x98d   :  { %v1232_v32 = vpop.f32.mrf.mxu0 }
 0x98f   :  { %v3946_v33 = vpop.f32.mrf.mxu0 }
 0x990   :  { %v1810_v33 = vld [vmem:[%s5054_s6 + $0x18] sm:$0xff] }
 0x991   :  { %v1308_v34 = vpop.f32.mrf.mxu1  ;;  %v1397_v35 = vpop.f32.mrf.mxu0 }
 0x992   :  { %v1398_v36 = vadd.f32 %v1397_v35, %v4607_v51  ;;  %v1893_v35 = vld [vmem:[#allocation9 + $0x8] sm:$0xff] }
 0x993   :  { %v3951_v37 = vpop.f32.mrf.mxu1  ;;  %v3956_v38 = vpop.f32.mrf.mxu0 }
 0x994   :  { %v1479_v39 = vsel %vm313_vm6, %v1398_v36, -inf  ;;  %v1892_v37 = vld [vmem:[#allocation9] sm:$0xff]  ;;  %v1808_v38 = vld [vmem:[%s5054_s6 + $0x8] sm:$0xff] }
 0x995   :  { %1480 = vmax.xlane.f32.xlu0 %v1479_v39  ;;  %v1475_v40 = vpop.f32.mrf.mxu1  ;;  %v148_v39 = vld [vmem:[#allocation3 + $0x8] sm:$0xff] }
 0x996   :  { %v1476_v41 = vadd.f32 %v1475_v40, %v4611_v55  ;;  %v1807_v40 = vld [vmem:[%s5054_s6] sm:$0xff] }
 0x997   :  { %v3961_v42 = vpop.f32.mrf.mxu1 }
 0x998   :  { %v1482_v43 = vsel %vm313_vm6, %v1476_v41, -inf }
 0x999   :  { %1483 = vmax.xlane.f32.xlu1 %v1482_v43 }
 0x9aa   :  { %1577 = vrot.lane.b32.xlu1 %v4586_v45, %s4408_s21 }
 0x9ae   :  { %973 = vrot.lane.b32.xlu1 %v4682_v60, %s4391_s2 }
 0x9b2   :  { %975 = vrot.lane.b32.xlu1 %v4684_v62, %s4391_s2 }
 0x9b6   :  { %1316 = vrot.lane.b32.xlu1 %v1308_v34, %s4409_s25  ;;  %v1809_v34 = vld [vmem:[%s5054_s6 + $0x10] sm:$0xff] }
 0xa1e   :  { %v1481_v51 = vpop.xlane.xlu0 %1480 }
 0xa1f   :  { %v1485_v47 = vsub.f32 %v1398_v36, %v1481_v51  ;;  %v147_v36 = vld [vmem:[#allocation3] sm:$0xff] }
 0xa21   :  { %v1487_v48 = vmul.f32 1.442695, %v1485_v47 }
 0xa22   :  { %v1484_v55 = vpop.xlane.xlu1 %1483 }
 0xa23   :  { %4182 = vpow2.f32 %v1487_v48  ;;  %v1486_v49 = vsub.f32 %v1476_v41, %v1484_v55 }
 0xa25   :  { %v1489_v50 = vmul.f32 1.442695, %v1486_v49 }
 0xa26   :  { %v1578_v52 = vpop.permute.xlu1 %1577 }
 0xa27   :  { %4184 = vpow2.f32 %v1489_v50  ;;  %3968 = vmatpush3.msra.mxu1 %v1578_v52 }
 0xa28   :  { %3983 = vmatprep.subr.mxu1 %v1810_v33 }
 0xa2a   :  { %v974_v45 = vpop.permute.xlu1 %973 }
 0xa2b   :  { %980 = vst.msk [vmem:[#allocation2] sm:$0xff] %vm979_vm9, %v974_v45 }
 0xa2e   :  { %v976_v53 = vpop.permute.xlu1 %975 }
 0xa2f   :  { %981 = vst.msk [vmem:[#allocation2 + $0x8] sm:$0xff] %vm979_vm9, %v976_v53 }
 0xa30   :  { %v4183_v54 = vpop.eup %4182 }
 0xa31   :  { %v1491_v56 = vsel %vm313_vm6, %v4183_v54, 0.0 }
 0xa32   :  { %1492 = vadd.xlane.f32.xlu0 %v1491_v56  ;;  %v1317_v57 = vpop.permute.xlu1 %1316 }
 0xa33   :  { %1322 = vst.msk [vmem:[#allocation2 + $0x8] sm:$0xff] %vm1320_vm10, %v1317_v57 }
 0xa34   :  { %v4185_v58 = vpop.eup %4184 }
 0xa35   :  { %v1494_v59 = vsel %vm313_vm6, %v4185_v58, 0.0 }
 0xa36   :  { %1495 = vadd.xlane.f32.xlu0 %v1494_v59 }
 0xa4c   :  { %1501 = vrot.lane.b32.xlu0 %v4590_v46, %s4408_s21  ;;  %v309_v46 = vld [vmem:[%s5053_s5 + $0x18] sm:$0xff]  ;;  %s5076_s5 = sld [smem:[#allocation22_spill]] }
 0xa50   :  { %1314 = vrot.lane.b32.xlu0 %v1232_v32, %s4409_s25  ;;  %v1894_v32 = vld [vmem:[#allocation9 + $0x10] sm:$0xff] }
 0xabb   :  { %v1493_v60 = vpop.xlane.xlu0 %1492 }
 0xabc   :  { %4186 = vrcp.f32 %v1493_v60  ;;  %v3731_v60 = vld [vmem:[%s5063_s15] ss:$0 sm:$0xff] }
 0xabf   :  { %v1496_v61 = vpop.xlane.xlu0 %1495 }
 0xac0   :  { %4188 = vrcp.f32 %v1496_v61 }
 0xac3   :  { %v1502_v62 = vpop.permute.xlu0 %1501 }
 0xac4   :  { %3963 = vmatpush3.msra.mxu0 %v1502_v62  ;;  %v3732_v62 = vld [vmem:[%s5064_s16] ss:$0 sm:$0xff] }
 0xac5   :  { %3972 = vmatprep.subr.mxu0 %v309_v46 }
 0xac7   :  { %v1315_v63 = vpop.permute.xlu0 %1314 }
 0xac8   :  { %1321 = vst.msk [vmem:[#allocation2] sm:$0xff] %vm1320_vm10, %v1315_v63 }
 0xac9   :  { %v4187_v2 = vpop.eup %4186 }
 0xaca   :  { %v1499_v3 = vmul.f32 %v4187_v2, %v4183_v54 }
 0xacc   :  { %3965 = vmatmul.mubr.msk.f32.vlgmr.msra.gmra.mxu0 %vm313_vm6, %v1499_v3 }
 0xacd   :  { %v4189_v4 = vpop.eup %4188  ;;  %3973 = vmatpush3.msra.mxu0 %v309_v46 }
 0xace   :  { %v1500_v5 = vmul.f32 %v4189_v4, %v4185_v58  ;;  %3974 = vmatprep.subr.mxu0 %v308_v6 }
 0xacf   :  { %3975 = vmatpush3.msra.mxu0 %v308_v6 }
 0xad0   :  { %3970 = vmatmul.mubr.msk.f32.vlgmr.msra.gmra.mxu1 %vm313_vm6, %v1500_v5  ;;  %3976 = vmatprep.subr.mxu0 %v307_v7 }
 0xad1   :  { %3977 = vmatpush3.msra.mxu0 %v307_v7  ;;  %3984 = vmatpush3.msra.mxu1 %v1810_v33 }
 0xad2   :  { %3978 = vmatprep.subr.mxu0 %v306_v8  ;;  %3985 = vmatprep.subr.mxu1 %v1809_v34 }
 0xad3   :  { %3979 = vmatpush3.msra.mxu0 %v306_v8  ;;  %3986 = vmatpush3.msra.mxu1 %v1809_v34 }
 0xad4   :  { %3994 = vmatprep.subr.mxu0 %v1895_v31  ;;  %3987 = vmatprep.subr.mxu1 %v1808_v38 }
 0xad5   :  { %3988 = vmatpush3.msra.mxu1 %v1808_v38 }
 0xad6   :  { %3989 = vmatprep.subr.mxu1 %v1807_v40 }
 0xad7   :  { %3990 = vmatpush3.msra.mxu1 %v1807_v40 }
 0xad8   :  { %4005 = vmatprep.subr.mxu1 %v4396_v44 }
 0xb8c   :  { %v1573_v9 = vpop.f32.mrf.mxu0 }
 0xb8d   :  { %1655 = vrot.lane.b32.xlu0 %v1573_v9, %s4410_s20 }
 0xb8e   :  { %v3966_v10 = vpop.f32.mrf.mxu0 }
 0xb8f   :  { %v1983_v10 = vlaneseq }
 0xb90   :  { %v1649_v11 = vpop.f32.mrf.mxu1 }
 0xb91   :  { %1657 = vrot.lane.b32.xlu1 %v1649_v11, %s4410_s20  ;;  %v155_v11 = vld [vmem:[%s5076_s5] sm:$0x1] }
 0xb92   :  { %v3971_v12 = vpop.f32.mrf.mxu1  ;;  %vm157_vm1 = vcmp.eq.s32.totalorder %v155_v11, 0 }
 0xb93   :  { %v1984_v12 = vshrl.u32 %v1983_v10, 7 }
 0xbff   :  { %v1656_v13 = vpop.permute.xlu0 %1655 }
 0xc00   :  { %1662 = vst.msk [vmem:[#allocation2] sm:$0xff] %vm1661_vm11, %v1656_v13  ;;  %v156_v13 = vld [vmem:[%s5076_s5 + $0x1] sm:$0x1] }
 0xc01   :  { %vm158_vm2 = vcmp.eq.s32.totalorder %v156_v13, 0 }
 0xc03   :  { %v1658_v14 = vpop.permute.xlu1 %1657 }
 0xc04   :  { %1663 = vst.msk [vmem:[#allocation2 + $0x8] sm:$0xff] %vm1661_vm11, %v1658_v14  ;;  %v1985_v14 = vsub.s32 0, %v1984_v12 }
 0xc07   :  { %v1664_v15 = vld [vmem:[#allocation2] sm:$0xff] }
 0xc08   :  { %3980 = vmatprep.mubr.msk.f32.mxu0 %vm163_vm0, %v1664_v15  ;;  %v159_v15 = vsel %vm157_vm1, -1e+09, %v4396_v44 }
 0xc0b   :  { %v1665_v16 = vld [vmem:[#allocation2 + $0x8] sm:$0xff] }
 0xc0c   :  { %3981 = vmatmul.mubr.msk.f32.vlgmr.msra.gmra.mxu0 %vm163_vm0, %v1665_v16  ;;  %v4839_v16 = vrot.slane %v159_v15, %v1985_v14 }
 0xc0d   :  { %3995 = vmatpush3.msra.mxu0 %v1895_v31  ;;  %4002 = vmatprep.mubr.msk.f32.mxu0 %vm163_vm0, %v147_v36 }
 0xc0e   :  { %3996 = vmatprep.subr.mxu0 %v1894_v32 }
 0xc0f   :  { %3997 = vmatpush3.msra.mxu0 %v1894_v32 }
 0xc10   :  { %3998 = vmatprep.subr.mxu0 %v1893_v35 }
 0xc11   :  { %3999 = vmatpush3.msra.mxu0 %v1893_v35 }
 0xc12   :  { %4000 = vmatprep.subr.mxu0 %v1892_v37 }
 0xc13   :  { %4001 = vmatpush3.msra.mxu0 %v1892_v37 }
 0xc14   :  { %4003 = vmatmul.mubr.msk.f32.vlgmr.msra.gmra.mxu0 %vm163_vm0, %v148_v39  ;;  %4015 = vmatprep.subr.mxu0 %v4396_v44 }
 0xc15   :  { %4017 = vmatprep.mubr.msk.f32.mxu0 %vm4397_vm5, %v4396_v44 }
 0xccc   :  { %v3982_v17 = vpop.f32.mrf.mxu0 }
 0xccd   :  { %v4759_v18 = vadd.f32 %v3982_v17, %v4550_v1  ;;  %v160_v17 = vsel %vm158_vm2, -1e+09, %v4396_v44 }
 0xcce   :  { %v1738_v19 = vpop.f32.mrf.mxu0 }
 0xccf   :  { %v4762_v20 = vadd.f32 %v1738_v19, %v4548_v0  ;;  %v1754_v21 = vsel %vm163_vm0, %v4759_v18, 0.0 }
 0xcd0   :  { %1755 = vadd.xlane.f32.xlu1 %v1754_v21 }
 0xcd1   :  { %v1751_v22 = vsel %vm163_vm0, %v4762_v20, 0.0 }
 0xcd2   :  { %1752 = vadd.xlane.f32.xlu0 %v1751_v22  ;;  %v4843_v22 = vrot.slane %v160_v17, %v1985_v14 }
 0xcd4   :  { %v4810_v6 = vpop.f32.mrf.mxu0 }
 0xcd6   :  { %v4812_v7 = vpop.f32.mrf.mxu0 }
 0xd59   :  { %v1756_v23 = vpop.xlane.xlu1 %1755 }
 0xd5a   :  { %v1758_v24 = vmul.f32 0.03125, %v1756_v23 }
 0xd5b   :  { %v1753_v25 = vpop.xlane.xlu0 %1752 }
 0xd5c   :  { %v1757_v26 = vmul.f32 0.03125, %v1753_v25  ;;  %v4769_v27 = vsub.f32 %v4759_v18, %v1758_v24 }
 0xd5e   :  { %v4772_v1 = vsub.f32 %v4762_v20, %v1757_v26  ;;  %v1762_v29 = vmul.f32 %v4769_v27, %v4769_v27 }
 0xd60   :  { %v1761_v0 = vmul.f32 %v4772_v1, %v4772_v1  ;;  %v1766_v30 = vsel %vm163_vm0, %v1762_v29, 0.0 }
 0xd62   :  { %v1763_v28 = vsel %vm163_vm0, %v1761_v0, 0.0 }
 0xd63   :  { %1764 = vadd.xlane.f32.xlu0 %v1763_v28 }
 0xd67   :  { %1767 = vadd.xlane.f32.xlu0 %v1766_v30 }
 0xdec   :  { %v1765_v41 = vpop.xlane.xlu0 %1764 }
 0xded   :  { %v1769_v42 = vmul.f32 0.032258064, %v1765_v41 }
 0xdef   :  { %4190 = vrsqrt.f32 %v1769_v42  ;;  %vm1773_vm12 = vcmp.eq.f32.partialorder %v1769_v42, inf  ;;  %v1776_v55 = vand.u32 2147483648, %v1769_v42  ;;  %vm1775_vm13 = vcmp.eq.f32.partialorder %v1769_v42, 0.0 }
 0xdf0   :  { %v1768_v43 = vpop.xlane.xlu0 %1767 }
 0xdf1   :  { %v1770_v51 = vmul.f32 0.032258064, %v1768_v43 }
 0xdf3   :  { %4192 = vrsqrt.f32 %v1770_v51  ;;  %vm1780_vm14 = vcmp.eq.f32.partialorder %v1770_v51, inf  ;;  %v1783_v54 = vand.u32 2147483648, %v1770_v51  ;;  %vm1782_vm15 = vcmp.eq.f32.partialorder %v1770_v51, 0.0 }
 0xdfc   :  { %v4191_v47 = vpop.eup %4190 }
 0xdfd   :  { %v1772_v48 = vmul.f32 %v4191_v47, %v1769_v42 }
 0xdff   :  { %v1774_v49 = vsel %vm1773_vm12, %v1769_v42, %v1772_v48 }
 0xe00   :  { %v4193_v50 = vpop.eup %4192  ;;  %v1777_v52 = vsel %vm1775_vm13, %v1776_v55, %v1774_v49 }
 0xe01   :  { %v1785_v45 = vadd.f32 1e-06, %v1777_v52  ;;  %v1779_v53 = vmul.f32 %v4193_v50, %v1770_v51 }
 0xe03   :  { %4194 = vrcp.f32 %v1785_v45  ;;  %v1781_v56 = vsel %vm1780_vm14, %v1770_v51, %v1779_v53 }
 0xe04   :  { %v1784_v57 = vsel %vm1782_vm15, %v1783_v54, %v1781_v56 }
 0xe05   :  { %v1786_v58 = vadd.f32 1e-06, %v1784_v57 }
 0xe07   :  { %4196 = vrcp.f32 %v1786_v58 }
 0xe10   :  { %v4195_v59 = vpop.eup %4194 }
 0xe11   :  { %v1788_v61 = vmul.f32 %v4195_v59, %v4772_v1 }
 0xe13   :  { %v1797_v63 = vmul.f32 %v3731_v60, %v1788_v61 }
 0xe14   :  { %v4197_v2 = vpop.eup %4196 }
 0xe15   :  { %v1790_v3 = vmul.f32 %v4197_v2, %v4769_v27  ;;  %v1805_v4 = vadd.f32 %v3732_v62, %v1797_v63 }
 0xe17   :  { %v1798_v5 = vmul.f32 %v3731_v60, %v1790_v3  ;;  %3991 = vmatprep.mubr.msk.f32.mxu1 %vm163_vm0, %v1805_v4 }
 0xe19   :  { %v1806_v46 = vadd.f32 %v3732_v62, %v1798_v5 }
 0xe1b   :  { %3992 = vmatmul.mubr.msk.f32.vlgmr.msra.gmra.mxu1 %vm163_vm0, %v1806_v46 }
 0xe1c   :  { %4007 = vmatprep.mubr.msk.f32.mxu1 %vm4397_vm5, %v4396_v44  ;;  %4006 = vmatpush3.xpose.msk.msra.mxu1 %vm313_vm6, %v4812_v7 }
 0xe1d   :  { %4010 = vmatprep.subr.mxu1 %v4396_v44 }
 0xedb   :  { %v4817_v8 = vpop.f32.mrf.mxu1 }
 0xedd   :  { %v4819_v9 = vpop.f32.mrf.mxu1 }
 0xede   :  { %4008 = vmatmul.mubr.msk.f32.vlgmr.msra.gmra.mxu1 %vm313_vm6, %v4819_v9 }
 0xedf   :  { %4011 = vmatpush3.xpose.msk.msra.mxu1 %vm313_vm6, %v4810_v6  ;;  %4012 = vmatprep.mubr.msk.f32.mxu1 %vm4397_vm5, %v4396_v44 }
 0xee0   :  { %4020 = vmatprep.subr.mxu1 %v4396_v44 }
 0xee2   :  { %4013 = vmatmul.mubr.msk.f32.vlgmr.msra.gmra.mxu1 %vm313_vm6, %v4817_v8 }
 0xee3   :  { %4022 = vmatprep.mubr.msk.f32.mxu1 %vm4397_vm5, %v4396_v44 }
 0xf9e   :  { %v2065_v19 = vpop.f32.mrf.mxu1 }
 0xf9f   :  { %v2066_v21 = vadd.f32 %v2065_v19, %v4839_v16 }
 0xfa0   :  { %v4009_v23 = vpop.f32.mrf.mxu1 }
 0xfa1   :  { %v2145_v24 = vsel %vm313_vm6, %v2066_v21, -inf }
 0xfa2   :  { %2146 = vmax.xlane.f32.xlu0 %v2145_v24  ;;  %v2141_v25 = vpop.f32.mrf.mxu1 }
 0xfa3   :  { %v2142_v26 = vadd.f32 %v2141_v25, %v4843_v22 }
 0xfa4   :  { %v4014_v27 = vpop.f32.mrf.mxu1 }
 0xfa5   :  { %v2148_v1 = vsel %vm313_vm6, %v2142_v26, -inf }
 0xfa6   :  { %2149 = vmax.xlane.f32.xlu1 %v2148_v1 }
 0xfb7   :  { %2243 = vrot.lane.b32.xlu1 %v4810_v6, %s4398_s13 }
 0xfbb   :  { %2323 = vrot.lane.b32.xlu1 %v4812_v7, %s4401_s1 }
 0xfbf   :  { %2401 = vrot.lane.b32.xlu1 %v4810_v6, %s4401_s1 }
0x102b   :  { %v2147_v0 = vpop.xlane.xlu0 %2146 }
0x102c   :  { %v2151_v28 = vsub.f32 %v2066_v21, %v2147_v0 }
0x102e   :  { %v2153_v29 = vmul.f32 1.442695, %v2151_v28 }
0x102f   :  { %v2150_v30 = vpop.xlane.xlu1 %2149 }
0x1030   :  { %4198 = vpow2.f32 %v2153_v29  ;;  %v2152_v31 = vsub.f32 %v2142_v26, %v2150_v30 }
0x1032   :  { %v2155_v32 = vmul.f32 1.442695, %v2152_v31 }
0x1033   :  { %v2244_v33 = vpop.permute.xlu1 %2243 }
0x1034   :  { %4200 = vpow2.f32 %v2155_v32  ;;  %4021 = vmatpush3.msra.mxu1 %v2244_v33 }
0x1035   :  { %4030 = vmatprep.subr.mxu1 %v4396_v44 }
0x1037   :  { %v2324_v38 = vpop.permute.xlu1 %2323 }
0x103b   :  { %v2402_v39 = vpop.permute.xlu1 %2401 }
0x103d   :  { %v4199_v34 = vpop.eup %4198 }
0x103e   :  { %v2157_v35 = vsel %vm313_vm6, %v4199_v34, 0.0 }
0x103f   :  { %2158 = vadd.xlane.f32.xlu0 %v2157_v35 }
0x1041   :  { %v4201_v36 = vpop.eup %4200 }
0x1042   :  { %v2160_v37 = vsel %vm313_vm6, %v4201_v36, 0.0 }
0x1043   :  { %2161 = vadd.xlane.f32.xlu1 %v2160_v37 }
0x1054   :  { %2399 = vrot.lane.b32.xlu1 %v4817_v8, %s4401_s1 }
0x1055   :  { %2167 = vrot.lane.b32.xlu0 %v4812_v7, %s4398_s13 }
0x1059   :  { %2321 = vrot.lane.b32.xlu0 %v4819_v9, %s4401_s1 }
0x10c8   :  { %v2159_v40 = vpop.xlane.xlu0 %2158 }
0x10c9   :  { %4202 = vrcp.f32 %v2159_v40 }
0x10cc   :  { %v2168_v41 = vpop.permute.xlu0 %2167  ;;  %v2162_v42 = vpop.xlane.xlu1 %2161 }
0x10cd   :  { %4204 = vrcp.f32 %v2162_v42  ;;  %4016 = vmatpush3.msra.mxu0 %v2168_v41 }
0x10ce   :  { %4025 = vmatprep.subr.mxu0 %v4396_v44 }
0x10d0   :  { %v2322_v55 = vpop.permute.xlu0 %2321  ;;  %v2400_v49 = vpop.permute.xlu1 %2399 }
0x10d6   :  { %v4203_v43 = vpop.eup %4202 }
0x10d7   :  { %v2165_v51 = vmul.f32 %v4203_v43, %v4199_v34 }
0x10d9   :  { %4018 = vmatmul.mubr.msk.f32.vlgmr.msra.gmra.mxu0 %vm313_vm6, %v2165_v51 }
0x10da   :  { %v4205_v47 = vpop.eup %4204  ;;  %4026 = vmatpush3.xpose.msk.msra.mxu0 %vm313_vm6, %v2324_v38  ;;  %4027 = vmatprep.mubr.msk.f32.mxu0 %vm4397_vm5, %v4396_v44 }
0x10db   :  { %v2166_v48 = vmul.f32 %v4205_v47, %v4201_v36  ;;  %4035 = vmatprep.subr.mxu0 %v4396_v44 }
0x10dd   :  { %4023 = vmatmul.mubr.msk.f32.vlgmr.msra.gmra.mxu1 %vm313_vm6, %v2166_v48  ;;  %4028 = vmatmul.mubr.msk.f32.vlgmr.msra.gmra.mxu0 %vm313_vm6, %v2322_v55 }
0x10de   :  { %4031 = vmatpush3.xpose.msk.msra.mxu1 %vm313_vm6, %v2402_v39  ;;  %4032 = vmatprep.mubr.msk.f32.mxu1 %vm4397_vm5, %v4396_v44 }
0x10df   :  { %4040 = vmatprep.subr.mxu1 %v4396_v44  ;;  %4037 = vmatprep.mubr.msk.f32.mxu0 %vm4397_vm5, %v4396_v44 }
0x10e1   :  { %4033 = vmatmul.mubr.msk.f32.vlgmr.msra.gmra.mxu1 %vm313_vm6, %v2400_v49 }
0x10e2   :  { %4042 = vmatprep.mubr.msk.f32.mxu1 %vm4397_vm5, %v4396_v44 }
0x1199   :  { %v2239_v50 = vpop.f32.mrf.mxu0 }
0x119a   :  { %2319 = vst.msk [vmem:[#allocation2] sm:$0xff] %vm313_vm6, %v2239_v50 }
0x119b   :  { %v4019_v52 = vpop.f32.mrf.mxu0 }
0x119d   :  { %v2315_v45 = vpop.f32.mrf.mxu1  ;;  %v2395_v53 = vpop.f32.mrf.mxu0 }
0x119e   :  { %2320 = vst.msk [vmem:[#allocation2 + $0x8] sm:$0xff] %vm313_vm6, %v2315_v45  ;;  %v2396_v54 = vadd.f32 %v2395_v53, %v4839_v16 }
0x119f   :  { %v4024_v56 = vpop.f32.mrf.mxu1  ;;  %v4029_v57 = vpop.f32.mrf.mxu0 }
0x11a0   :  { %v2477_v58 = vsel %vm313_vm6, %v2396_v54, -inf }
0x11a1   :  { %2478 = vmax.xlane.f32.xlu0 %v2477_v58  ;;  %v2473_v59 = vpop.f32.mrf.mxu1 }
0x11a2   :  { %v2474_v60 = vadd.f32 %v2473_v59, %v4843_v22 }
0x11a3   :  { %v4034_v61 = vpop.f32.mrf.mxu1 }
0x11a4   :  { %v2480_v62 = vsel %vm313_vm6, %v2474_v60, -inf }
0x11a5   :  { %2481 = vmax.xlane.f32.xlu1 %v2480_v62 }
0x11b6   :  { %2575 = vrot.lane.b32.xlu1 %v4810_v6, %s4400_s30 }
0x11b7   :  { %2499 = vrot.lane.b32.xlu0 %v4812_v7, %s4400_s30 }
0x11ba   :  { %2663 = vrot.lane.b32.xlu1 %v4812_v7, %s4404_s24 }
0x11be   :  { %2741 = vrot.lane.b32.xlu1 %v4810_v6, %s4404_s24 }
0x11c2   :  { %2739 = vrot.lane.b32.xlu1 %v4817_v8, %s4404_s24 }
0x122a   :  { %v2479_v63 = vpop.xlane.xlu0 %2478 }
0x122b   :  { %v2483_v2 = vsub.f32 %v2396_v54, %v2479_v63 }
0x122d   :  { %v2485_v3 = vmul.f32 1.442695, %v2483_v2 }
0x122e   :  { %v2500_v4 = vpop.permute.xlu0 %2499  ;;  %v2482_v5 = vpop.xlane.xlu1 %2481 }
0x122f   :  { %4206 = vpow2.f32 %v2485_v3  ;;  %v2484_v46 = vsub.f32 %v2474_v60, %v2482_v5  ;;  %4036 = vmatpush3.msra.mxu0 %v2500_v4 }
0x1230   :  { %4045 = vmatprep.subr.mxu0 %v4396_v44 }
0x1231   :  { %v2487_v10 = vmul.f32 1.442695, %v2484_v46 }
0x1232   :  { %v2576_v11 = vpop.permute.xlu1 %2575 }
0x1233   :  { %4208 = vpow2.f32 %v2487_v10  ;;  %4041 = vmatpush3.msra.mxu1 %v2576_v11 }
0x1234   :  { %4050 = vmatprep.subr.mxu1 %v4396_v44 }
0x1236   :  { %v2664_v21 = vpop.permute.xlu1 %2663 }
0x123a   :  { %v2742_v26 = vpop.permute.xlu1 %2741 }
0x123c   :  { %v4207_v12 = vpop.eup %4206 }
0x123d   :  { %v2489_v13 = vsel %vm313_vm6, %v4207_v12, 0.0 }
0x123e   :  { %2490 = vadd.xlane.f32.xlu0 %v2489_v13  ;;  %v2740_v0 = vpop.permute.xlu1 %2739 }
0x1240   :  { %v4209_v14 = vpop.eup %4208 }
0x1241   :  { %v2492_v15 = vsel %vm313_vm6, %v4209_v14, 0.0 }
0x1242   :  { %2493 = vadd.xlane.f32.xlu0 %v2492_v15 }
0x1258   :  { %2661 = vrot.lane.b32.xlu0 %v4819_v9, %s4404_s24 }
0x12c7   :  { %v2491_v17 = vpop.xlane.xlu0 %2490 }
0x12c8   :  { %4210 = vrcp.f32 %v2491_v17 }
0x12cb   :  { %v2494_v19 = vpop.xlane.xlu0 %2493 }
0x12cc   :  { %4212 = vrcp.f32 %v2494_v19 }
0x12cf   :  { %v2662_v1 = vpop.permute.xlu0 %2661 }
0x12d5   :  { %v4211_v23 = vpop.eup %4210 }
0x12d6   :  { %v2497_v24 = vmul.f32 %v4211_v23, %v4207_v12 }
0x12d8   :  { %4038 = vmatmul.mubr.msk.f32.vlgmr.msra.gmra.mxu0 %vm313_vm6, %v2497_v24 }
0x12d9   :  { %v4213_v25 = vpop.eup %4212  ;;  %4046 = vmatpush3.xpose.msk.msra.mxu0 %vm313_vm6, %v2664_v21  ;;  %4047 = vmatprep.mubr.msk.f32.mxu0 %vm4397_vm5, %v4396_v44 }
0x12da   :  { %v2498_v27 = vmul.f32 %v4213_v25, %v4209_v14  ;;  %4055 = vmatprep.subr.mxu0 %v4396_v44 }
0x12dc   :  { %4043 = vmatmul.mubr.msk.f32.vlgmr.msra.gmra.mxu1 %vm313_vm6, %v2498_v27  ;;  %4048 = vmatmul.mubr.msk.f32.vlgmr.msra.gmra.mxu0 %vm313_vm6, %v2662_v1 }
0x12dd   :  { %4051 = vmatpush3.xpose.msk.msra.mxu1 %vm313_vm6, %v2742_v26  ;;  %4052 = vmatprep.mubr.msk.f32.mxu1 %vm4397_vm5, %v4396_v44 }
0x12de   :  { %4060 = vmatprep.subr.mxu1 %v4396_v44  ;;  %4057 = vmatprep.mubr.msk.f32.mxu0 %vm4397_vm5, %v4396_v44 }
0x12e0   :  { %4053 = vmatmul.mubr.msk.f32.vlgmr.msra.gmra.mxu1 %vm313_vm6, %v2740_v0 }
0x12e1   :  { %4062 = vmatprep.mubr.msk.f32.mxu1 %vm4397_vm5, %v4396_v44 }
0x1398   :  { %v4918_v28 = vpop.f32.mrf.mxu0 }
0x139a   :  { %v4039_v29 = vpop.f32.mrf.mxu0 }
0x139c   :  { %v4920_v30 = vpop.f32.mrf.mxu1  ;;  %v2735_v31 = vpop.f32.mrf.mxu0 }
0x139d   :  { %v2736_v32 = vadd.f32 %v2735_v31, %v4839_v16 }
0x139e   :  { %v4044_v33 = vpop.f32.mrf.mxu1  ;;  %v4049_v34 = vpop.f32.mrf.mxu0 }
0x139f   :  { %v2817_v35 = vsel %vm313_vm6, %v2736_v32, -inf }
0x13a0   :  { %2818 = vmax.xlane.f32.xlu0 %v2817_v35  ;;  %v2813_v36 = vpop.f32.mrf.mxu1  ;;  %v1979_v35 = vld [vmem:[#allocation11 + $0x10] sm:$0xff] }
0x13a1   :  { %v2814_v37 = vadd.f32 %v2813_v36, %v4843_v22  ;;  %v1978_v36 = vld [vmem:[#allocation11 + $0x8] sm:$0xff] }
0x13a2   :  { %v4054_v38 = vpop.f32.mrf.mxu1 }
0x13a3   :  { %v2820_v39 = vsel %vm313_vm6, %v2814_v37, -inf }
0x13a4   :  { %2821 = vmax.xlane.f32.xlu1 %v2820_v39 }
0x13b5   :  { %2915 = vrot.lane.b32.xlu1 %v4810_v6, %s4403_s23 }
0x13b6   :  { %2839 = vrot.lane.b32.xlu0 %v4812_v7, %s4403_s23 }
0x13b9   :  { %3003 = vrot.lane.b32.xlu1 %v4812_v7, %s4407_s7 }
0x13bd   :  { %3081 = vrot.lane.b32.xlu1 %v4810_v6, %s4407_s7 }
0x13c1   :  { %3079 = vrot.lane.b32.xlu1 %v4817_v8, %s4407_s7 }
0x1429   :  { %v2819_v40 = vpop.xlane.xlu0 %2818 }
0x142a   :  { %v2823_v41 = vsub.f32 %v2736_v32, %v2819_v40 }
0x142c   :  { %v2825_v42 = vmul.f32 1.442695, %v2823_v41 }
0x142d   :  { %v2840_v43 = vpop.permute.xlu0 %2839  ;;  %v2822_v51 = vpop.xlane.xlu1 %2821 }
0x142e   :  { %4214 = vpow2.f32 %v2825_v42  ;;  %v2824_v47 = vsub.f32 %v2814_v37, %v2822_v51  ;;  %4056 = vmatpush3.msra.mxu0 %v2840_v43  ;;  %v1977_v37 = vld [vmem:[#allocation11] sm:$0xff] }
0x142f   :  { %4065 = vmatprep.subr.mxu0 %v4396_v44 }
0x1430   :  { %v2827_v48 = vmul.f32 1.442695, %v2824_v47 }
0x1431   :  { %v2916_v55 = vpop.permute.xlu1 %2915 }
0x1432   :  { %4216 = vpow2.f32 %v2827_v48  ;;  %4061 = vmatpush3.msra.mxu1 %v2916_v55 }
0x1433   :  { %4070 = vmatprep.subr.mxu1 %v4396_v44 }
0x1435   :  { %v3004_v54 = vpop.permute.xlu1 %3003 }
0x1439   :  { %v3082_v59 = vpop.permute.xlu1 %3081 }
0x143b   :  { %v4215_v49 = vpop.eup %4214 }
0x143c   :  { %v2829_v50 = vsel %vm313_vm6, %v4215_v49, 0.0 }
0x143d   :  { %2830 = vadd.xlane.f32.xlu0 %v2829_v50  ;;  %v3080_v61 = vpop.permute.xlu1 %3079 }
0x143f   :  { %v4217_v8 = vpop.eup %4216 }
0x1440   :  { %v2832_v52 = vsel %vm313_vm6, %v4217_v8, 0.0 }
0x1441   :  { %2833 = vadd.xlane.f32.xlu0 %v2832_v52 }
0x1457   :  { %3001 = vrot.lane.b32.xlu0 %v4819_v9, %s4407_s7 }
0x14c6   :  { %v2831_v45 = vpop.xlane.xlu0 %2830 }
0x14c7   :  { %4218 = vrcp.f32 %v2831_v45 }
0x14ca   :  { %v2834_v53 = vpop.xlane.xlu0 %2833 }
0x14cb   :  { %4220 = vrcp.f32 %v2834_v53 }
0x14ce   :  { %v3002_v9 = vpop.permute.xlu0 %3001 }
0x14d4   :  { %v4219_v56 = vpop.eup %4218 }
0x14d5   :  { %v2837_v57 = vmul.f32 %v4219_v56, %v4215_v49 }
0x14d7   :  { %4058 = vmatmul.mubr.msk.f32.vlgmr.msra.gmra.mxu0 %vm313_vm6, %v2837_v57 }
0x14d8   :  { %v4221_v58 = vpop.eup %4220  ;;  %4066 = vmatpush3.xpose.msk.msra.mxu0 %vm313_vm6, %v3004_v54  ;;  %4067 = vmatprep.mubr.msk.f32.mxu0 %vm4397_vm5, %v4396_v44 }
0x14d9   :  { %v2838_v60 = vmul.f32 %v4221_v58, %v4217_v8  ;;  %4075 = vmatprep.subr.mxu0 %v4396_v44 }
0x14db   :  { %4063 = vmatmul.mubr.msk.f32.vlgmr.msra.gmra.mxu1 %vm313_vm6, %v2838_v60  ;;  %4068 = vmatmul.mubr.msk.f32.vlgmr.msra.gmra.mxu0 %vm313_vm6, %v3002_v9  ;;  %v3487_v9 = vld [vmem:[#allocation12 + $0x18] sm:$0xff] }
0x14dc   :  { %4071 = vmatpush3.xpose.msk.msra.mxu1 %vm313_vm6, %v3082_v59  ;;  %4072 = vmatprep.mubr.msk.f32.mxu1 %vm4397_vm5, %v4396_v44 }
0x14dd   :  { %4080 = vmatprep.subr.mxu1 %v4396_v44  ;;  %4077 = vmatprep.mubr.msk.f32.mxu0 %vm4397_vm5, %v4396_v44 }
0x14df   :  { %4073 = vmatmul.mubr.msk.f32.vlgmr.msra.gmra.mxu1 %vm313_vm6, %v3080_v61  ;;  %v3486_v61 = vld [vmem:[#allocation12 + $0x10] sm:$0xff] }
0x14e0   :  { %4082 = vmatprep.mubr.msk.f32.mxu1 %vm4397_vm5, %v4396_v44 }
0x1597   :  { %v2911_v62 = vpop.f32.mrf.mxu0 }
0x1599   :  { %v4059_v63 = vpop.f32.mrf.mxu0 }
0x159a   :  { %v3484_v63 = vld [vmem:[#allocation12] sm:$0xff] }
0x159b   :  { %v2987_v2 = vpop.f32.mrf.mxu1  ;;  %v3075_v3 = vpop.f32.mrf.mxu0 }
0x159c   :  { %v3076_v4 = vadd.f32 %v3075_v3, %v4839_v16  ;;  %v3584_v3 = vld [vmem:[%s5059_s11 + $0x30] sm:$0xff] }
0x159d   :  { %v4064_v5 = vpop.f32.mrf.mxu1  ;;  %v4069_v46 = vpop.f32.mrf.mxu0 }
0x159e   :  { %v3157_v10 = vsel %vm313_vm6, %v3076_v4, -inf  ;;  %v3582_v5 = vld [vmem:[%s5059_s11 + $0x20] sm:$0xff] }
0x159f   :  { %3158 = vmax.xlane.f32.xlu0 %v3157_v10  ;;  %v3153_v11 = vpop.f32.mrf.mxu1 }
0x15a0   :  { %v3154_v12 = vadd.f32 %v3153_v11, %v4843_v22 }
0x15a1   :  { %v4074_v13 = vpop.f32.mrf.mxu1 }
0x15a2   :  { %v3160_v14 = vsel %vm313_vm6, %v3154_v12, -inf }
0x15a3   :  { %3161 = vmax.xlane.f32.xlu1 %v3160_v14 }
0x15b4   :  { %3255 = vrot.lane.b32.xlu1 %v4810_v6, %s4406_s9 }
0x15b8   :  { %2653 = vrot.lane.b32.xlu1 %v4918_v28, %s4391_s2 }
0x15bc   :  { %2655 = vrot.lane.b32.xlu1 %v4920_v30, %s4391_s2 }
0x15c0   :  { %2995 = vrot.lane.b32.xlu1 %v2987_v2, %s4409_s25  ;;  %v3585_v2 = vld [vmem:[%s5059_s11 + $0x38] sm:$0xff] }
0x1628   :  { %v3159_v44 = vpop.xlane.xlu0 %3158 }
0x1629   :  { %v3163_v16 = vsub.f32 %v3076_v4, %v3159_v44  ;;  %v3583_v4 = vld [vmem:[%s5059_s11 + $0x28] sm:$0xff] }
0x162b   :  { %v3165_v15 = vmul.f32 1.442695, %v3163_v16 }
0x162c   :  { %v3162_v17 = vpop.xlane.xlu1 %3161 }
0x162d   :  { %4222 = vpow2.f32 %v3165_v15  ;;  %v3164_v22 = vsub.f32 %v3154_v12, %v3162_v17 }
0x162f   :  { %v3167_v19 = vmul.f32 1.442695, %v3164_v22 }
0x1630   :  { %v3256_v21 = vpop.permute.xlu1 %3255 }
0x1631   :  { %4224 = vpow2.f32 %v3167_v19  ;;  %4081 = vmatpush3.msra.mxu1 %v3256_v21 }
0x1632   :  { %4096 = vmatprep.subr.mxu1 %v3487_v9 }
0x1634   :  { %v2654_v23 = vpop.permute.xlu1 %2653 }
0x1635   :  { %2659 = vst.msk [vmem:[#allocation2] sm:$0xff] %vm979_vm9, %v2654_v23 }
0x1638   :  { %v2656_v6 = vpop.permute.xlu1 %2655 }
0x1639   :  { %2660 = vst.msk [vmem:[#allocation2 + $0x8] sm:$0xff] %vm979_vm9, %v2656_v6 }
0x163a   :  { %v4223_v24 = vpop.eup %4222 }
0x163b   :  { %v3169_v25 = vsel %vm313_vm6, %v4223_v24, 0.0 }
0x163c   :  { %3170 = vadd.xlane.f32.xlu0 %v3169_v25  ;;  %v2996_v26 = vpop.permute.xlu1 %2995 }
0x163d   :  { %3000 = vst.msk [vmem:[#allocation2 + $0x8] sm:$0xff] %vm1320_vm10, %v2996_v26  ;;  %v3763_v26 = vld [vmem:[%s5065_s17] ss:$0 sm:$0xff] }
0x163e   :  { %v4225_v27 = vpop.eup %4224 }
0x163f   :  { %v3172_v1 = vsel %vm313_vm6, %v4225_v27, 0.0 }
0x1640   :  { %3173 = vadd.xlane.f32.xlu0 %v3172_v1  ;;  %v3764_v1 = vld [vmem:[%s5066_s18] ss:$0 sm:$0xff] }
0x1656   :  { %3179 = vrot.lane.b32.xlu0 %v4812_v7, %s4406_s9  ;;  %v1980_v7 = vld [vmem:[#allocation11 + $0x18] sm:$0xff] }
0x165a   :  { %2993 = vrot.lane.b32.xlu0 %v2911_v62, %s4409_s25  ;;  %v3485_v62 = vld [vmem:[#allocation12 + $0x8] sm:$0xff] }
0x16c5   :  { %v3171_v0 = vpop.xlane.xlu0 %3170 }
0x16c6   :  { %4226 = vrcp.f32 %v3171_v0 }
0x16c9   :  { %v3174_v28 = vpop.xlane.xlu0 %3173 }
0x16ca   :  { %4228 = vrcp.f32 %v3174_v28 }
0x16cd   :  { %v3180_v29 = vpop.permute.xlu0 %3179 }
0x16ce   :  { %4076 = vmatpush3.msra.mxu0 %v3180_v29 }
0x16cf   :  { %4085 = vmatprep.subr.mxu0 %v1980_v7 }
0x16d1   :  { %v2994_v30 = vpop.permute.xlu0 %2993 }
0x16d2   :  { %2999 = vst.msk [vmem:[#allocation2] sm:$0xff] %vm1320_vm10, %v2994_v30 }
0x16d3   :  { %v4227_v31 = vpop.eup %4226 }
0x16d4   :  { %v3177_v32 = vmul.f32 %v4227_v31, %v4223_v24 }
0x16d6   :  { %4078 = vmatmul.mubr.msk.f32.vlgmr.msra.gmra.mxu0 %vm313_vm6, %v3177_v32 }
0x16d7   :  { %v4229_v33 = vpop.eup %4228  ;;  %4086 = vmatpush3.msra.mxu0 %v1980_v7  ;;  %v3579_v7 = vld [vmem:[%s5059_s11 + $0x8] sm:$0xff] }
0x16d8   :  { %v3178_v34 = vmul.f32 %v4229_v33, %v4225_v27  ;;  %4087 = vmatprep.subr.mxu0 %v1979_v35  ;;  %v3581_v33 = vld [vmem:[%s5059_s11 + $0x18] sm:$0xff] }
0x16d9   :  { %4088 = vmatpush3.msra.mxu0 %v1979_v35  ;;  %v3578_v35 = vld [vmem:[%s5059_s11] sm:$0xff] }
0x16da   :  { %4083 = vmatmul.mubr.msk.f32.vlgmr.msra.gmra.mxu1 %vm313_vm6, %v3178_v34  ;;  %4089 = vmatprep.subr.mxu0 %v1978_v36  ;;  %v3580_v34 = vld [vmem:[%s5059_s11 + $0x10] sm:$0xff]  ;;  %s4411_s11 = smov [#allocation14]  }
0x16db   :  { %4090 = vmatpush3.msra.mxu0 %v1978_v36  ;;  %4097 = vmatpush3.msra.mxu1 %v3487_v9  ;;  %v3765_v36 = vld [vmem:[%s5058_s10] ss:$0 sm:$0xff]  ;;  %s3686_s21 = sshll.u32 %s4411_s11, 4  ;;  %s3687_s21 = int_to_ptr.vmem [resolvable:$true] %s3686_s21 }
0x16dc   :  { %4091 = vmatprep.subr.mxu0 %v1977_v37  ;;  %4098 = vmatprep.subr.mxu1 %v3486_v61  ;;  %s4358_s10 = scalar_lea.vmem %s3687_s21, 256  ;;  %p4363_p3 = scmp.lt.s32.totalorder %s3687_s21, %s3687_s21 }
0x16dd   :  { %4092 = vmatpush3.msra.mxu0 %v1977_v37  ;;  %4099 = vmatpush3.msra.mxu1 %v3486_v61  ;;  %p4359_p2 = scmp.ne.s32.totalorder %s3687_s21, %s4358_s10  ;;  %p4364_p4 = scmp.lt.s32.totalorder %s4358_s10, %s4358_s10 }
0x16de   :  { %4100 = vmatprep.subr.mxu1 %v3485_v62  ;;  %4107 = vmatprep.subr.mxu0 %v3585_v2 }
0x16df   :  { %4101 = vmatpush3.msra.mxu1 %v3485_v62  ;;  %p4365_p5 = por %p4364_p4, %p4363_p3 }
0x16e0   :  { %4102 = vmatprep.subr.mxu1 %v3484_v63 }
0x16e1   :  { %4103 = vmatpush3.msra.mxu1 %v3484_v63  ;;  %p4366_p6 = pnand %p4365_p5, %p4359_p2 }
0x1796   :  { %v3251_v38 = vpop.f32.mrf.mxu0 }
0x1797   :  { %3333 = vrot.lane.b32.xlu0 %v3251_v38, %s4410_s20 }
0x1798   :  { %v4079_v39 = vpop.f32.mrf.mxu0 }
0x179a   :  { %v3327_v40 = vpop.f32.mrf.mxu1 }
0x179b   :  { %3335 = vrot.lane.b32.xlu1 %v3327_v40, %s4410_s20 }
0x179c   :  { %v4084_v41 = vpop.f32.mrf.mxu1 }
0x1809   :  { %v3334_v42 = vpop.permute.xlu0 %3333 }
0x180a   :  { %3339 = vst.msk [vmem:[#allocation2] sm:$0xff] %vm1661_vm11, %v3334_v42 }
0x180d   :  { %v3336_v43 = vpop.permute.xlu1 %3335 }
0x180e   :  { %3340 = vst.msk [vmem:[#allocation2 + $0x8] sm:$0xff] %vm1661_vm11, %v3336_v43 }
0x1811   :  { %v3341_v51 = vld [vmem:[#allocation2] sm:$0xff] }
0x1812   :  { %4093 = vmatprep.mubr.msk.f32.mxu0 %vm163_vm0, %v3341_v51  ;;  %v3770_v51 = vld [vmem:[%s5060_s12] ss:$0 sm:$0xff] }
0x1815   :  { %v3342_v47 = vld [vmem:[#allocation2 + $0x8] sm:$0xff] }
0x1816   :  { %4094 = vmatmul.mubr.msk.f32.vlgmr.msra.gmra.mxu0 %vm163_vm0, %v3342_v47 }
0x1817   :  { %4108 = vmatpush3.msra.mxu0 %v3585_v2 }
0x1818   :  { %4109 = vmatprep.subr.mxu0 %v3584_v3 }
0x1819   :  { %4110 = vmatpush3.msra.mxu0 %v3584_v3 }
0x181a   :  { %4111 = vmatprep.subr.mxu0 %v3583_v4 }
0x181b   :  { %4112 = vmatpush3.msra.mxu0 %v3583_v4 }
0x181c   :  { %4113 = vmatprep.subr.mxu0 %v3582_v5 }
0x181d   :  { %4114 = vmatpush3.msra.mxu0 %v3582_v5 }
0x181e   :  { %4115 = vmatprep.subr.mxu0 %v3581_v33 }
0x181f   :  { %4116 = vmatpush3.msra.mxu0 %v3581_v33 }
0x1820   :  { %4117 = vmatprep.subr.mxu0 %v3580_v34 }
0x1821   :  { %4118 = vmatpush3.msra.mxu0 %v3580_v34 }
0x1822   :  { %4119 = vmatprep.subr.mxu0 %v3579_v7 }
0x1823   :  { %4120 = vmatpush3.msra.mxu0 %v3579_v7 }
0x1824   :  { %4121 = vmatprep.subr.mxu0 %v3578_v35 }
0x1825   :  { %4122 = vmatpush3.msra.mxu0 %v3578_v35 }
0x18d6   :  { %v4095_v48 = vpop.f32.mrf.mxu0 }
0x18d7   :  { %v4987_v55 = vadd.f32 %v4095_v48, %v4759_v18 }
0x18d8   :  { %v3415_v49 = vpop.f32.mrf.mxu0 }
0x18d9   :  { %v4990_v50 = vadd.f32 %v3415_v49, %v4762_v20  ;;  %v3431_v8 = vsel %vm163_vm0, %v4987_v55, 0.0 }
0x18da   :  { %3432 = vadd.xlane.f32.xlu1 %v3431_v8 }
0x18db   :  { %v3428_v52 = vsel %vm163_vm0, %v4990_v50, 0.0 }
0x18dc   :  { %3429 = vadd.xlane.f32.xlu0 %v3428_v52 }
0x1963   :  { %v3433_v45 = vpop.xlane.xlu1 %3432 }
0x1964   :  { %v3435_v53 = vmul.f32 0.03125, %v3433_v45 }
0x1965   :  { %v3430_v54 = vpop.xlane.xlu0 %3429 }
0x1966   :  { %v3434_v56 = vmul.f32 0.03125, %v3430_v54  ;;  %v3437_v57 = vsub.f32 %v4987_v55, %v3435_v53 }
0x1968   :  { %v3436_v18 = vsub.f32 %v4990_v50, %v3434_v56  ;;  %v3439_v59 = vmul.f32 %v3437_v57, %v3437_v57 }
0x196a   :  { %v3438_v58 = vmul.f32 %v3436_v18, %v3436_v18  ;;  %v3443_v60 = vsel %vm163_vm0, %v3439_v59, 0.0 }
0x196c   :  { %v3440_v20 = vsel %vm163_vm0, %v3438_v58, 0.0 }
0x196d   :  { %3441 = vadd.xlane.f32.xlu0 %v3440_v20 }
0x1971   :  { %3444 = vadd.xlane.f32.xlu0 %v3443_v60 }
0x19f6   :  { %v3442_v46 = vpop.xlane.xlu0 %3441 }
0x19f7   :  { %v3446_v10 = vmul.f32 0.032258064, %v3442_v46 }
0x19f9   :  { %4230 = vrsqrt.f32 %v3446_v10  ;;  %vm3450_vm3 = vcmp.eq.f32.partialorder %v3446_v10, inf  ;;  %v3453_v44 = vand.u32 2147483648, %v3446_v10  ;;  %vm3452_vm4 = vcmp.eq.f32.partialorder %v3446_v10, 0.0 }
0x19fa   :  { %v3445_v11 = vpop.xlane.xlu0 %3444 }
0x19fb   :  { %v3447_v12 = vmul.f32 0.032258064, %v3445_v11 }
0x19fd   :  { %4232 = vrsqrt.f32 %v3447_v12  ;;  %vm3457_vm5 = vcmp.eq.f32.partialorder %v3447_v12, inf  ;;  %v3460_v21 = vand.u32 2147483648, %v3447_v12  ;;  %vm3459_vm6 = vcmp.eq.f32.partialorder %v3447_v12, 0.0 }
0x1a06   :  { %v4231_v13 = vpop.eup %4230 }
0x1a07   :  { %v3449_v14 = vmul.f32 %v4231_v13, %v3446_v10 }
0x1a09   :  { %v3451_v16 = vsel %vm3450_vm3, %v3446_v10, %v3449_v14 }
0x1a0a   :  { %v4233_v15 = vpop.eup %4232  ;;  %v3454_v17 = vsel %vm3452_vm4, %v3453_v44, %v3451_v16 }
0x1a0b   :  { %v3462_v22 = vadd.f32 1e-06, %v3454_v17  ;;  %v3456_v19 = vmul.f32 %v4233_v15, %v3447_v12 }
0x1a0d   :  { %4234 = vrcp.f32 %v3462_v22  ;;  %v3458_v23 = vsel %vm3457_vm5, %v3447_v12, %v3456_v19 }
0x1a0e   :  { %v3461_v6 = vsel %vm3459_vm6, %v3460_v21, %v3458_v23 }
0x1a0f   :  { %v3463_v24 = vadd.f32 1e-06, %v3461_v6 }
0x1a11   :  { %4236 = vrcp.f32 %v3463_v24 }
0x1a1a   :  { %v4235_v25 = vpop.eup %4234 }
0x1a1b   :  { %v3465_v27 = vmul.f32 %v4235_v25, %v3436_v18 }
0x1a1d   :  { %v3474_v0 = vmul.f32 %v3763_v26, %v3465_v27 }
0x1a1e   :  { %v4237_v28 = vpop.eup %4236 }
0x1a1f   :  { %v3467_v29 = vmul.f32 %v4237_v28, %v3437_v57  ;;  %v3482_v30 = vadd.f32 %v3764_v1, %v3474_v0 }
0x1a21   :  { %v3475_v31 = vmul.f32 %v3763_v26, %v3467_v29  ;;  %4104 = vmatprep.mubr.msk.f32.mxu1 %vm163_vm0, %v3482_v30 }
0x1a23   :  { %v3483_v32 = vadd.f32 %v3764_v1, %v3475_v31 }
0x1a25   :  { %4105 = vmatmul.mubr.msk.f32.vlgmr.msra.gmra.mxu1 %vm163_vm0, %v3483_v32 }
0x1ae5   :  { %v4106_v37 = vpop.f32.mrf.mxu1 }
0x1ae6   :  { %v3573_v38 = vadd.f32 %v4106_v37, %v3765_v36 }
0x1ae7   :  { %v3567_v39 = vpop.f32.mrf.mxu1 }
0x1ae8   :  { %v3568_v40 = vadd.f32 %v3765_v36, %v3567_v39  ;;  %v3577_v42 = vmax.f32 %v3573_v38, 0.0 }
0x1aea   :  { %v3576_v41 = vmax.f32 %v3568_v40, 0.0 }
0x1aec   :  { %4123 = vmatprep.mubr.msk.f32.mxu0 %vm3586_vm7, %v3576_v41 }
0x1aed   :  { %4124 = vmatmul.mubr.msk.f32.vlgmr.msra.gmra.mxu0 %vm3586_vm7, %v3577_v42 }
0x1bad   :  { %v4125_v43 = vpop.f32.mrf.mxu0 }
0x1bae   :  { %v3669_v47 = vadd.f32 %v4125_v43, %v4987_v55 }
0x1baf   :  { %v3659_v48 = vpop.f32.mrf.mxu0 }
0x1bb0   :  { %v3678_v49 = vadd.f32 %v3770_v51, %v3669_v47  ;;  %v3668_v8 = vadd.f32 %v3659_v48, %v4990_v50 }
0x1bb2   :  { %3680 = vst.msk [vmem:[#allocation14 + $0x8] sm:$0xff] %vm163_vm0, %v3678_v49  ;;  %v3677_v52 = vadd.f32 %v3770_v51, %v3668_v8 }
0x1bb4   :  { %3679 = vst.msk [vmem:[#allocation14] sm:$0xff] %vm163_vm0, %v3677_v52 }
0x1bb5   :  { %4369 = shalt.err (!%p4366_p6)
}
0x1bb6   :  { %3692 = dma.vmem_to_hbm [thread:$0]  %s3687_s21, 256, %s5067_s19, [#allocation5], %s4390_s22, %s4390_s22, %s4391_s2  }
0x1bb7   :  { %4386 = dma.done.wait [#allocation5], 256  }
0x1bb8   :  { %4387 = vsyncadd [#allocation5], 4294967040 }
0x1bb9   :  { %3696 = vsyncpa [#allocation4], 1 }
0x1bba   :  { %3697 = vsyncpa [#allocation7], 1 }
0x1bbb   :  { %3698 = vsyncpa [#allocation10], 1 }
0x1bbc   :  { %3699 = vsyncpa [#allocation13], 1 }
0x1bbd   :  { %3700 = vsyncpa [#allocation5], 1 }

</bundles_post_ra>
